<compile_context>
chip_gen: v5e
topology: v5e:2x2
jax: 0.10.0
libtpu: 0.0.40
codegen_flags: <defaults>
</compile_context>

<pallas_src>
import numpy as np
import jax
import jax.numpy as jnp
from jax import lax
from jax.experimental import pallas as pl
from jax.experimental.pallas import tpu as pltpu

# ----- module hyper-parameters (mirror ConvSubsamplingPreEncode.__init__) ----
FEAT_IN = 32
FEAT_OUT = 32
CONV_CHANNELS = (4, 8)
KERNEL_SIZES = ((11, 21), (11, 11))
STRIDES = ((1, 1), (3, 1))
STATE_LENS = tuple(KERNEL_SIZES[i][0] - STRIDES[i][0] for i in range(2))  # (10, 8)

BN_EPS = 1e-5
# TODO(synk): RMSNorm implementation is not in the reference source; the standard
# x * rsqrt(mean(x^2, -1) + eps) * weight (eps=1e-6) is assumed.
RMS_EPS = 1e-6

B = 2
T_IN = 16

C1, C2 = CONV_CHANNELS
KT1, KF1 = KERNEL_SIZES[0]
KT2, KF2 = KERNEL_SIZES[1]
ST1, SF1 = STRIDES[0]
ST2, SF2 = STRIDES[1]
PAD1, PAD2 = STATE_LENS

# spatial sizes after each conv (non-streaming: causal left zero-pad in time)
T1 = (T_IN + PAD1 - KT1) // ST1 + 1          # 16
F1 = (FEAT_IN - KF1) // SF1 + 1              # 12
T2 = (T1 + PAD2 - KT2) // ST2 + 1            # 5
F2 = (F1 - KF2) // SF2 + 1                   # 2

F1C1 = F1 * C1                               # 48
F2C2 = F2 * C2                               # 16

# --- staging / over-compute geometry (everything 8-row aligned) ---
PAD1A = ((PAD1 + 7) // 8) * 8                # 16  conv1 pad rounded up to a sublane tile
OFF1 = PAD1A - PAD1                          # 6
TPAD1 = PAD1A + T_IN                         # 32  padded conv1 input rows / batch elem
T2A = ((T2 + 7) // 8) * 8                    # 8   output rows carried through the tail
T2B = (((T2 - 1) * ST2 + 1 + 7) // 8) * 8    # 16  stride-1 conv2 rows computed / batch
TP2B = ((max(PAD2 + T1, T2B + KT2 - 1) + 7) // 8) * 8   # 32 padded conv2 input rows

assert T1 % 8 == 0 and T2B % 8 == 0 and T2A % 8 == 0
assert T2B >= (T2 - 1) * ST2 + 1
assert TP2B >= max(PAD2 + T1, T2B + KT2 - 1)
assert FEAT_IN + F1C1 + F2C2 + FEAT_OUT == 128   # lane-dense packing of small params


# ------------------------------ Pallas kernel --------------------------------
def _subsample_kernel(x_ref, small_ref, sel_ref, w1_ref, w2_ref, wout_ref,
                      o_ref, xpad_ref, h1pad_ref):
    bb = x_ref.shape[0]                       # batch elements in this grid step
    f32 = jnp.float32
    bf16 = jnp.bfloat16

    # --- unpack the lane-dense (1, 128) small-parameter row ---
    sp = small_ref[...]
    gpre = sp[:, 0:FEAT_IN]                                        # (1, 32)
    sh1 = sp[:, FEAT_IN:FEAT_IN + F1C1]                            # (1, 48)
    sh2 = sp[:, FEAT_IN + F1C1:FEAT_IN + F1C1 + F2C2]              # (1, 16)
    gout = sp[:, FEAT_IN + F1C1 + F2C2:]                           # (1, 32)

    # --- input RMSNorm ---
    x = x_ref[...]                                                 # (bb, T_IN, 32)
    xn = x * lax.rsqrt(jnp.mean(x * x, axis=-1, keepdims=True) + RMS_EPS) * gpre

    # --- stage causally padded input (pad rounded up to a full sublane tile;
    #     re-zeroed every step so the kernel is safe for any grid split) ---
    xpad_ref[:, 0:PAD1A, :] = jnp.zeros((bb, PAD1A, FEAT_IN), f32)
    xpad_ref[:, PAD1A:, :] = xn

    # --- conv1 (+ folded BN1): KT1 accumulated matmuls, M = bb*T1 ---
    acc1 = jnp.zeros((bb * T1, F1C1), f32)
    for dt in range(KT1):
        slab = xpad_ref[:, OFF1 + dt:OFF1 + dt + T1, :]            # (bb, T1, 32)
        slab = slab.reshape(bb * T1, FEAT_IN).astype(bf16)
        acc1 = acc1 + jnp.dot(slab, w1_ref[dt], preferred_element_type=f32)
    h1 = acc1 + sh1
    h1 = h1 * jax.nn.sigmoid(h1)                                   # SiLU, (bb*T1, 48)

    # --- stage causally padded conv1 output for conv2 ---
    h1pad_ref[:, 0:PAD2, :] = jnp.zeros((bb, PAD2, F1C1), f32)
    h1pad_ref[:, PAD2:PAD2 + T1, :] = h1.reshape(bb, T1, F1C1)
    h1pad_ref[:, PAD2 + T1:, :] = jnp.zeros((bb, TP2B - PAD2 - T1, F1C1), f32)

    # --- conv2 (+ folded BN2) evaluated at time-stride 1 (cheap over-compute on
    #     8-aligned row counts); KT2 accumulated matmuls, M = bb*T2B ---
    acc2 = jnp.zeros((bb * T2B, F2C2), f32)
    for dt in range(KT2):
        slab = h1pad_ref[:, dt:dt + T2B, :]                        # (bb, T2B, 48)
        slab = slab.reshape(bb * T2B, F1C1).astype(bf16)
        acc2 = acc2 + jnp.dot(slab, w2_ref[dt], preferred_element_type=f32)

    # --- stride-ST2 time subsampling folded into one tiny 0/1 selection matmul ---
    h2 = jnp.dot(sel_ref[...], acc2, preferred_element_type=f32)   # (bb*T2A, 16)
    h2 = h2 + sh2
    h2 = h2 * jax.nn.sigmoid(h2)                                   # SiLU

    # --- output projection (bias-free Linear) + output RMSNorm, fused over block ---
    y = jnp.dot(h2.astype(bf16), wout_ref[...], preferred_element_type=f32)
    y = y * lax.rsqrt(jnp.mean(y * y, axis=-1, keepdims=True) + RMS_EPS) * gout
    y = y.reshape(bb, T2A, FEAT_OUT)                               # clean 8-aligned split
    o_ref[...] = y[:, :T2, :]


# ------------------------------ wrapper ---------------------------------------
def get_output_length(lengths):
    for i in range(2):
        lengths = (lengths - KERNEL_SIZES[i][0] + STATE_LENS[i]) // STRIDES[i][0] + 1
    return lengths.astype(jnp.int32)


def _selection_matrix(bb):
    """(bb*T2A, bb*T2B) 0/1 matrix picking stride-ST2 rows out of the stride-1 conv2."""
    s = np.zeros((bb * T2A, bb * T2B), np.float32)
    for b in range(bb):
        for t2 in range(T2):
            s[b * T2A + t2, b * T2B + t2 * ST2] = 1.0
    return jnp.asarray(s)


def conv_subsampling_pre_encode(x, lengths, kparams, block_b=None):
    """x: (B, T_IN, FEAT_IN) float32 -> ((B, T2, FEAT_OUT) float32, lengths)."""
    small, w1c, w2c, wr = kparams
    bsz = x.shape[0]
    # Single-TC chips (v5e/v6e): keep the whole batch in one grid step.  On v7x,
    # pass block_b = bsz // 2 once the per-core work amortizes the per-step overhead.
    bb = bsz if block_b is None else block_b
    assert bsz % bb == 0
    sel = _selection_matrix(bb)
    grid = (bsz // bb,)

    flops = (2 * bsz * (T1 * KT1 * FEAT_IN * F1C1
                        + T2B * KT2 * F1C1 * F2C2
                        + T2A * F2C2 * FEAT_OUT)
             + 2 * (bsz // bb) * (bb * T2A) * (bb * T2B) * F2C2)
    transcendentals = bsz * (T1 * F1C1 + T2A * F2C2)
    bytes_accessed = (x.size * 4 + bsz * T2 * FEAT_OUT * 4
                      + int(small.size) * 4 + int(sel.size) * 4
                      + (int(w1c.size) + int(w2c.size) + int(wr.size)) * 2)

    out = pl.pallas_call(
        _subsample_kernel,
        out_shape=jax.ShapeDtypeStruct((bsz, T2, FEAT_OUT), jnp.float32),
        grid_spec=pltpu.PrefetchScalarGridSpec(
            num_scalar_prefetch=0,
            grid=grid,
            in_specs=[
                pl.BlockSpec((bb, T_IN, FEAT_IN), lambda i: (i, 0, 0)),
                pl.BlockSpec((1, 128), lambda i: (0, 0)),
                pl.BlockSpec((bb * T2A, bb * T2B), lambda i: (0, 0)),
                pl.BlockSpec((KT1, FEAT_IN, F1C1), lambda i: (0, 0, 0)),
                pl.BlockSpec((KT2, F1C1, F2C2), lambda i: (0, 0, 0)),
                pl.BlockSpec((F2C2, FEAT_OUT), lambda i: (0, 0)),
            ],
            out_specs=pl.BlockSpec((bb, T2, FEAT_OUT), lambda i: (i, 0, 0)),
            scratch_shapes=[
                pltpu.VMEM((bb, TPAD1, FEAT_IN), jnp.float32),   # padded conv1 input
                pltpu.VMEM((bb, TP2B, F1C1), jnp.float32),       # padded conv1 output
            ],
        ),
        compiler_params=pltpu.CompilerParams(dimension_semantics=("parallel",)),
        cost_estimate=pl.CostEstimate(flops=int(flops),
                                      transcendentals=int(transcendentals),
                                      bytes_accessed=int(bytes_accessed)),
    )(x, small, sel, w1c, w2c, wr)

    out_lengths = get_output_length(lengths) if lengths is not None else None
    return out, out_lengths


# ------------------------ deterministic parameter init ------------------------
def init_raw_params(key):
    ks = jax.random.split(key, 11)
    p = {}
    p["g_pre"] = 1.0 + 0.1 * jax.random.normal(ks[0], (FEAT_IN,), jnp.float32)
    p["w1"] = jax.random.normal(ks[1], (C1, 1, KT1, KF1), jnp.float32) / np.sqrt(KT1 * KF1)
    p["b1"] = 0.1 * jax.random.normal(ks[2], (C1,), jnp.float32)
    p["bn1_g"] = 1.0 + 0.1 * jax.random.normal(ks[3], (C1,), jnp.float32)
    p["bn1_b"] = 0.1 * jax.random.normal(ks[4], (C1,), jnp.float32)
    p["bn1_m"] = jnp.zeros((C1,), jnp.float32)
    p["bn1_v"] = jnp.ones((C1,), jnp.float32)
    p["w2"] = jax.random.normal(ks[5], (C2, C1, KT2, KF2), jnp.float32) / np.sqrt(C1 * KT2 * KF2)
    p["b2"] = 0.1 * jax.random.normal(ks[6], (C2,), jnp.float32)
    p["bn2_g"] = 1.0 + 0.1 * jax.random.normal(ks[7], (C2,), jnp.float32)
    p["bn2_b"] = 0.1 * jax.random.normal(ks[8], (C2,), jnp.float32)
    p["bn2_m"] = jnp.zeros((C2,), jnp.float32)
    p["bn2_v"] = jnp.ones((C2,), jnp.float32)
    p["w_out"] = jax.random.normal(ks[9], (FEAT_OUT, C2 * F2), jnp.float32) / np.sqrt(C2 * F2)
    p["g_out"] = 1.0 + 0.1 * jax.random.normal(ks[10], (FEAT_OUT,), jnp.float32)
    return p


def pack_kernel_params(p):
    """Re-express torch NCHW conv weights as per-time-tap matmul matrices (pure glue).

    Eval-mode BatchNorm scale is folded into the weight columns (bf16); the shift
    (conv bias + BN) and the two RMSNorm gains are packed into one (1, 128) f32 row.
    """
    scale1 = np.asarray(p["bn1_g"]) / np.sqrt(np.asarray(p["bn1_v"]) + BN_EPS)
    shift1 = np.asarray(p["bn1_b"]) + scale1 * (np.asarray(p["b1"]) - np.asarray(p["bn1_m"]))
    scale2 = np.asarray(p["bn2_g"]) / np.sqrt(np.asarray(p["bn2_v"]) + BN_EPS)
    shift2 = np.asarray(p["bn2_b"]) + scale2 * (np.asarray(p["b2"]) - np.asarray(p["bn2_m"]))

    # conv1 tap dt: (FEAT_IN, F1*C1); columns indexed f1*C1 + c1
    w1 = np.asarray(p["w1"])                      # (C1, 1, KT1, KF1)
    w1c = np.zeros((KT1, FEAT_IN, F1C1), np.float32)
    for dt in range(KT1):
        for f1 in range(F1):
            for df in range(KF1):
                w1c[dt, f1 * SF1 + df, f1 * C1:(f1 + 1) * C1] = w1[:, 0, dt, df] * scale1

    # conv2 tap dt: (F1*C1, F2*C2); rows fi*C1 + c1, columns f2*C2 + c2
    w2 = np.asarray(p["w2"])                      # (C2, C1, KT2, KF2)
    w2c = np.zeros((KT2, F1C1, F2C2), np.float32)
    for dt in range(KT2):
        for f2 in range(F2):
            for df in range(KF2):
                fi = f2 * SF2 + df
                w2c[dt, fi * C1:(fi + 1) * C1, f2 * C2:(f2 + 1) * C2] = \
                    w2[:, :, dt, df].T * scale2[None, :]

    # Linear weight: torch column index is c2*F2 + f2; kernel rows are f2*C2 + c2
    w_out = np.asarray(p["w_out"])                # (FEAT_OUT, C2*F2)
    wr = w_out.reshape(FEAT_OUT, C2, F2).transpose(2, 1, 0).reshape(F2C2, FEAT_OUT)

    small = np.concatenate([
        np.asarray(p["g_pre"], np.float32),
        np.tile(shift1, F1).astype(np.float32),
        np.tile(shift2, F2).astype(np.float32),
        np.asarray(p["g_out"], np.float32),
    ])[None, :]
    assert small.shape == (1, 128)

    return (jnp.asarray(small, jnp.float32),
            jnp.asarray(w1c, jnp.bfloat16),
            jnp.asarray(w2c, jnp.bfloat16),
            jnp.asarray(wr, jnp.bfloat16))


# ------------------------------ pure-JAX reference ----------------------------
def reference_forward(x, p):
    def rms(v, g):
        return v * lax.rsqrt(jnp.mean(v * v, axis=-1, keepdims=True) + RMS_EPS) * g

    h = rms(x, p["g_pre"])[:, None, :, :]                       # (B,1,T,F) NCHW
    h = jnp.pad(h, ((0, 0), (0, 0), (PAD1, 0), (0, 0)))
    h = lax.conv_general_dilated(h, p["w1"], window_strides=STRIDES[0], padding="VALID",
                                 dimension_numbers=("NCHW", "OIHW", "NCHW"),
                                 precision=lax.Precision.HIGHEST)
    h = h + p["b1"][None, :, None, None]
    h = ((h - p["bn1_m"][None, :, None, None]) /
         jnp.sqrt(p["bn1_v"][None, :, None, None] + BN_EPS)) * \
        p["bn1_g"][None, :, None, None] + p["bn1_b"][None, :, None, None]
    h = h * jax.nn.sigmoid(h)
    h = jnp.pad(h, ((0, 0), (0, 0), (PAD2, 0), (0, 0)))
    h = lax.conv_general_dilated(h, p["w2"], window_strides=STRIDES[1], padding="VALID",
                                 dimension_numbers=("NCHW", "OIHW", "NCHW"),
                                 precision=lax.Precision.HIGHEST)
    h = h + p["b2"][None, :, None, None]
    h = ((h - p["bn2_m"][None, :, None, None]) /
         jnp.sqrt(p["bn2_v"][None, :, None, None] + BN_EPS)) * \
        p["bn2_g"][None, :, None, None] + p["bn2_b"][None, :, None, None]
    h = h * jax.nn.sigmoid(h)
    flat = jnp.transpose(h, (0, 2, 1, 3)).reshape(h.shape[0], h.shape[2], -1)
    y = jnp.einsum("btf,of->bto", flat, p["w_out"], precision=lax.Precision.HIGHEST)
    return rms(y, p["g_out"])


# ----------------------------------- main --------------------------------------
if __name__ == "__main__":
    key = jax.random.PRNGKey(0)
    kx, kp = jax.random.split(key)
    x = jax.random.normal(kx, (B, T_IN, FEAT_IN), jnp.float32)
    lengths = jnp.array([T_IN, T_IN - 4], jnp.int32)

    raw = init_raw_params(kp)
    kparams = pack_kernel_params(raw)

    out, out_len = conv_subsampling_pre_encode(x, lengths, kparams)
    out = jax.block_until_ready(out)
    out_len = jax.block_until_ready(out_len)

    assert out.shape == (B, T2, FEAT_OUT), out.shape
    ref = reference_forward(x, raw)
    err = float(jnp.max(jnp.abs(out - ref)))
    # bf16 packed weights / activations vs an f32 HIGHEST-precision reference.
    assert err < 8e-2, f"max abs error vs reference: {err}"
    assert list(np.asarray(out_len)) == [5, 4]
    print("KERNEL_OK")
</pallas_src>

<mosaic_0001>
module attributes {stable_mosaic.version = 11 : i64} {
  func.func @_subsample_kernel(%arg0: i32, %arg1: memref<2x16x32xf32, #tpu.memory_space<vmem>>, %arg2: memref<1x128xf32, #tpu.memory_space<vmem>>, %arg3: memref<16x32xf32, #tpu.memory_space<vmem>>, %arg4: memref<11x32x48xbf16, #tpu.memory_space<vmem>>, %arg5: memref<11x48x16xbf16, #tpu.memory_space<vmem>>, %arg6: memref<16x32xbf16, #tpu.memory_space<vmem>>, %arg7: memref<2x5x32xf32, #tpu.memory_space<vmem>>, %arg8: memref<2x32x32xf32, #tpu.memory_space<vmem>>, %arg9: memref<2x32x48xf32, #tpu.memory_space<vmem>>) attributes {dimension_semantics = [#tpu.dimension_semantics<parallel>], iteration_bounds = array<i64: 1>, scalar_prefetch = 0 : i64, scratch_operands = 2 : i64, tpu.core_type = #tpu.core_type<tc>, window_params = [{transform_indices = @transform_0, window_bounds = array<i64: 2, 16, 32>}, {pipeline_mode = #tpu.pipeline_mode<synchronous>, transform_indices = @transform_1, window_bounds = array<i64: 1, 128>}, {pipeline_mode = #tpu.pipeline_mode<synchronous>, transform_indices = @transform_2, window_bounds = array<i64: 16, 32>}, {pipeline_mode = #tpu.pipeline_mode<synchronous>, transform_indices = @transform_3, window_bounds = array<i64: 11, 32, 48>}, {pipeline_mode = #tpu.pipeline_mode<synchronous>, transform_indices = @transform_4, window_bounds = array<i64: 11, 48, 16>}, {pipeline_mode = #tpu.pipeline_mode<synchronous>, transform_indices = @transform_5, window_bounds = array<i64: 16, 32>}, {transform_indices = @transform_6, window_bounds = array<i64: 2, 5, 32>}]} {
    %c0 = arith.constant 0 : index
    %c0_0 = arith.constant 0 : index
    %0 = vector.load %arg2[%c0, %c0_0] : memref<1x128xf32, #tpu.memory_space<vmem>>, vector<1x128xf32>
    %1 = vector.extract_strided_slice %0 {offsets = [0, 0], sizes = [1, 32], strides = [1, 1]} : vector<1x128xf32> to vector<1x32xf32>
    %2 = vector.extract_strided_slice %0 {offsets = [0, 32], sizes = [1, 48], strides = [1, 1]} : vector<1x128xf32> to vector<1x48xf32>
    %3 = vector.extract_strided_slice %0 {offsets = [0, 80], sizes = [1, 16], strides = [1, 1]} : vector<1x128xf32> to vector<1x16xf32>
    %4 = vector.extract_strided_slice %0 {offsets = [0, 96], sizes = [1, 32], strides = [1, 1]} : vector<1x128xf32> to vector<1x32xf32>
    %c0_1 = arith.constant 0 : index
    %c0_2 = arith.constant 0 : index
    %c0_3 = arith.constant 0 : index
    %5 = vector.load %arg1[%c0_1, %c0_2, %c0_3] : memref<2x16x32xf32, #tpu.memory_space<vmem>>, vector<2x16x32xf32>
    %6 = arith.mulf %5, %5 : vector<2x16x32xf32>
    %cst = arith.constant dense<0.000000e+00> : vector<2x16xf32>
    %7 = vector.multi_reduction <add>, %6, %cst [2] : vector<2x16x32xf32> to vector<2x16xf32>
    %8 = vector.shape_cast %7 : vector<2x16xf32> to vector<2x16x1xf32>
    %cst_4 = arith.constant 3.200000e+01 : f32
    %9 = vector.broadcast %cst_4 : f32 to vector<2x16x1xf32>
    %10 = arith.divf %8, %9 : vector<2x16x1xf32>
    %cst_5 = arith.constant 9.99999997E-7 : f32
    %11 = vector.broadcast %cst_5 : f32 to vector<2x16x1xf32>
    %12 = arith.addf %10, %11 : vector<2x16x1xf32>
    %13 = math.rsqrt %12 : vector<2x16x1xf32>
    %14 = vector.broadcast %13 : vector<2x16x1xf32> to vector<2x16x32xf32>
    %15 = arith.mulf %5, %14 : vector<2x16x32xf32>
    %16 = vector.shape_cast %1 : vector<1x32xf32> to vector<1x1x32xf32>
    %17 = vector.broadcast %16 : vector<1x1x32xf32> to vector<2x16x32xf32>
    %18 = arith.mulf %15, %17 : vector<2x16x32xf32>
    %cst_6 = arith.constant 0.000000e+00 : f32
    %19 = vector.broadcast %cst_6 : f32 to vector<2x16x32xf32>
    %c0_7 = arith.constant 0 : index
    %c0_8 = arith.constant 0 : index
    %c0_9 = arith.constant 0 : index
    %20 = vector.load %arg8[%c0_7, %c0_8, %c0_9] : memref<2x32x32xf32, #tpu.memory_space<vmem>>, vector<2x16x32xf32>
    tpu.vector_store %arg8[%c0_7, %c0_8, %c0_9], %19 {strides = array<i32>} : memref<2x32x32xf32, #tpu.memory_space<vmem>>, vector<2x16x32xf32>,
    %c0_10 = arith.constant 0 : index
    %c16 = arith.constant 16 : index
    %c0_11 = arith.constant 0 : index
    %21 = vector.load %arg8[%c0_10, %c16, %c0_11] : memref<2x32x32xf32, #tpu.memory_space<vmem>>, vector<2x16x32xf32>
    tpu.vector_store %arg8[%c0_10, %c16, %c0_11], %18 {strides = array<i32>} : memref<2x32x32xf32, #tpu.memory_space<vmem>>, vector<2x16x32xf32>,
    %cst_12 = arith.constant 0.000000e+00 : f32
    %22 = vector.broadcast %cst_12 : f32 to vector<32x48xf32>
    %c0_13 = arith.constant 0 : index
    %c6 = arith.constant 6 : index
    %c0_14 = arith.constant 0 : index
    %23 = vector.load %arg8[%c0_13, %c6, %c0_14] : memref<2x32x32xf32, #tpu.memory_space<vmem>>, vector<2x16x32xf32>
    %24 = vector.shape_cast %23 : vector<2x16x32xf32> to vector<32x32xf32>
    %25 = arith.truncf %24 : vector<32x32xf32> to vector<32x32xbf16>
    %c0_15 = arith.constant 0 : index
    %c0_16 = arith.constant 0 : index
    %c0_17 = arith.constant 0 : index
    %26 = vector.load %arg4[%c0_15, %c0_16, %c0_17] : memref<11x32x48xbf16, #tpu.memory_space<vmem>>, vector<1x32x48xbf16>
    %27 = vector.shape_cast %26 : vector<1x32x48xbf16> to vector<32x48xbf16>
    %cst_18 = arith.constant dense<0.000000e+00> : vector<32x48xf32>
    %28 = tpu.matmul %25, %27, %cst_18 {dimension_numbers = #tpu.dot_dimension_numbers<[1], [0], [0], [1], [0, 0, 1, 1], [], []>} : vector<32x32xbf16>, vector<32x48xbf16>, vector<32x48xf32> -> vector<32x48xf32>
    %29 = arith.addf %22, %28 : vector<32x48xf32>
    %c0_19 = arith.constant 0 : index
    %c7 = arith.constant 7 : index
    %c0_20 = arith.constant 0 : index
    %30 = vector.load %arg8[%c0_19, %c7, %c0_20] : memref<2x32x32xf32, #tpu.memory_space<vmem>>, vector<2x16x32xf32>
    %31 = vector.shape_cast %30 : vector<2x16x32xf32> to vector<32x32xf32>
    %32 = arith.truncf %31 : vector<32x32xf32> to vector<32x32xbf16>
    %c1 = arith.constant 1 : index
    %c0_21 = arith.constant 0 : index
    %c0_22 = arith.constant 0 : index
    %33 = vector.load %arg4[%c1, %c0_21, %c0_22] : memref<11x32x48xbf16, #tpu.memory_space<vmem>>, vector<1x32x48xbf16>
    %34 = vector.shape_cast %33 : vector<1x32x48xbf16> to vector<32x48xbf16>
    %cst_23 = arith.constant dense<0.000000e+00> : vector<32x48xf32>
    %35 = tpu.matmul %32, %34, %cst_23 {dimension_numbers = #tpu.dot_dimension_numbers<[1], [0], [0], [1], [0, 0, 1, 1], [], []>} : vector<32x32xbf16>, vector<32x48xbf16>, vector<32x48xf32> -> vector<32x48xf32>
    %36 = arith.addf %29, %35 : vector<32x48xf32>
    %c0_24 = arith.constant 0 : index
    %c8 = arith.constant 8 : index
    %c0_25 = arith.constant 0 : index
    %37 = vector.load %arg8[%c0_24, %c8, %c0_25] : memref<2x32x32xf32, #tpu.memory_space<vmem>>, vector<2x16x32xf32>
    %38 = vector.shape_cast %37 : vector<2x16x32xf32> to vector<32x32xf32>
    %39 = arith.truncf %38 : vector<32x32xf32> to vector<32x32xbf16>
    %c2 = arith.constant 2 : index
    %c0_26 = arith.constant 0 : index
    %c0_27 = arith.constant 0 : index
    %40 = vector.load %arg4[%c2, %c0_26, %c0_27] : memref<11x32x48xbf16, #tpu.memory_space<vmem>>, vector<1x32x48xbf16>
    %41 = vector.shape_cast %40 : vector<1x32x48xbf16> to vector<32x48xbf16>
    %cst_28 = arith.constant dense<0.000000e+00> : vector<32x48xf32>
    %42 = tpu.matmul %39, %41, %cst_28 {dimension_numbers = #tpu.dot_dimension_numbers<[1], [0], [0], [1], [0, 0, 1, 1], [], []>} : vector<32x32xbf16>, vector<32x48xbf16>, vector<32x48xf32> -> vector<32x48xf32>
    %43 = arith.addf %36, %42 : vector<32x48xf32>
    %c0_29 = arith.constant 0 : index
    %c9 = arith.constant 9 : index
    %c0_30 = arith.constant 0 : index
    %44 = vector.load %arg8[%c0_29, %c9, %c0_30] : memref<2x32x32xf32, #tpu.memory_space<vmem>>, vector<2x16x32xf32>
    %45 = vector.shape_cast %44 : vector<2x16x32xf32> to vector<32x32xf32>
    %46 = arith.truncf %45 : vector<32x32xf32> to vector<32x32xbf16>
    %c3 = arith.constant 3 : index
    %c0_31 = arith.constant 0 : index
    %c0_32 = arith.constant 0 : index
    %47 = vector.load %arg4[%c3, %c0_31, %c0_32] : memref<11x32x48xbf16, #tpu.memory_space<vmem>>, vector<1x32x48xbf16>
    %48 = vector.shape_cast %47 : vector<1x32x48xbf16> to vector<32x48xbf16>
    %cst_33 = arith.constant dense<0.000000e+00> : vector<32x48xf32>
    %49 = tpu.matmul %46, %48, %cst_33 {dimension_numbers = #tpu.dot_dimension_numbers<[1], [0], [0], [1], [0, 0, 1, 1], [], []>} : vector<32x32xbf16>, vector<32x48xbf16>, vector<32x48xf32> -> vector<32x48xf32>
    %50 = arith.addf %43, %49 : vector<32x48xf32>
    %c0_34 = arith.constant 0 : index
    %c10 = arith.constant 10 : index
    %c0_35 = arith.constant 0 : index
    %51 = vector.load %arg8[%c0_34, %c10, %c0_35] : memref<2x32x32xf32, #tpu.memory_space<vmem>>, vector<2x16x32xf32>
    %52 = vector.shape_cast %51 : vector<2x16x32xf32> to vector<32x32xf32>
    %53 = arith.truncf %52 : vector<32x32xf32> to vector<32x32xbf16>
    %c4 = arith.constant 4 : index
    %c0_36 = arith.constant 0 : index
    %c0_37 = arith.constant 0 : index
    %54 = vector.load %arg4[%c4, %c0_36, %c0_37] : memref<11x32x48xbf16, #tpu.memory_space<vmem>>, vector<1x32x48xbf16>
    %55 = vector.shape_cast %54 : vector<1x32x48xbf16> to vector<32x48xbf16>
    %cst_38 = arith.constant dense<0.000000e+00> : vector<32x48xf32>
    %56 = tpu.matmul %53, %55, %cst_38 {dimension_numbers = #tpu.dot_dimension_numbers<[1], [0], [0], [1], [0, 0, 1, 1], [], []>} : vector<32x32xbf16>, vector<32x48xbf16>, vector<32x48xf32> -> vector<32x48xf32>
    %57 = arith.addf %50, %56 : vector<32x48xf32>
    %c0_39 = arith.constant 0 : index
    %c11 = arith.constant 11 : index
    %c0_40 = arith.constant 0 : index
    %58 = vector.load %arg8[%c0_39, %c11, %c0_40] : memref<2x32x32xf32, #tpu.memory_space<vmem>>, vector<2x16x32xf32>
    %59 = vector.shape_cast %58 : vector<2x16x32xf32> to vector<32x32xf32>
    %60 = arith.truncf %59 : vector<32x32xf32> to vector<32x32xbf16>
    %c5 = arith.constant 5 : index
    %c0_41 = arith.constant 0 : index
    %c0_42 = arith.constant 0 : index
    %61 = vector.load %arg4[%c5, %c0_41, %c0_42] : memref<11x32x48xbf16, #tpu.memory_space<vmem>>, vector<1x32x48xbf16>
    %62 = vector.shape_cast %61 : vector<1x32x48xbf16> to vector<32x48xbf16>
    %cst_43 = arith.constant dense<0.000000e+00> : vector<32x48xf32>
    %63 = tpu.matmul %60, %62, %cst_43 {dimension_numbers = #tpu.dot_dimension_numbers<[1], [0], [0], [1], [0, 0, 1, 1], [], []>} : vector<32x32xbf16>, vector<32x48xbf16>, vector<32x48xf32> -> vector<32x48xf32>
    %64 = arith.addf %57, %63 : vector<32x48xf32>
    %c0_44 = arith.constant 0 : index
    %c12 = arith.constant 12 : index
    %c0_45 = arith.constant 0 : index
    %65 = vector.load %arg8[%c0_44, %c12, %c0_45] : memref<2x32x32xf32, #tpu.memory_space<vmem>>, vector<2x16x32xf32>
    %66 = vector.shape_cast %65 : vector<2x16x32xf32> to vector<32x32xf32>
    %67 = arith.truncf %66 : vector<32x32xf32> to vector<32x32xbf16>
    %c6_46 = arith.constant 6 : index
    %c0_47 = arith.constant 0 : index
    %c0_48 = arith.constant 0 : index
    %68 = vector.load %arg4[%c6_46, %c0_47, %c0_48] : memref<11x32x48xbf16, #tpu.memory_space<vmem>>, vector<1x32x48xbf16>
    %69 = vector.shape_cast %68 : vector<1x32x48xbf16> to vector<32x48xbf16>
    %cst_49 = arith.constant dense<0.000000e+00> : vector<32x48xf32>
    %70 = tpu.matmul %67, %69, %cst_49 {dimension_numbers = #tpu.dot_dimension_numbers<[1], [0], [0], [1], [0, 0, 1, 1], [], []>} : vector<32x32xbf16>, vector<32x48xbf16>, vector<32x48xf32> -> vector<32x48xf32>
    %71 = arith.addf %64, %70 : vector<32x48xf32>
    %c0_50 = arith.constant 0 : index
    %c13 = arith.constant 13 : index
    %c0_51 = arith.constant 0 : index
    %72 = vector.load %arg8[%c0_50, %c13, %c0_51] : memref<2x32x32xf32, #tpu.memory_space<vmem>>, vector<2x16x32xf32>
    %73 = vector.shape_cast %72 : vector<2x16x32xf32> to vector<32x32xf32>
    %74 = arith.truncf %73 : vector<32x32xf32> to vector<32x32xbf16>
    %c7_52 = arith.constant 7 : index
    %c0_53 = arith.constant 0 : index
    %c0_54 = arith.constant 0 : index
    %75 = vector.load %arg4[%c7_52, %c0_53, %c0_54] : memref<11x32x48xbf16, #tpu.memory_space<vmem>>, vector<1x32x48xbf16>
    %76 = vector.shape_cast %75 : vector<1x32x48xbf16> to vector<32x48xbf16>
    %cst_55 = arith.constant dense<0.000000e+00> : vector<32x48xf32>
    %77 = tpu.matmul %74, %76, %cst_55 {dimension_numbers = #tpu.dot_dimension_numbers<[1], [0], [0], [1], [0, 0, 1, 1], [], []>} : vector<32x32xbf16>, vector<32x48xbf16>, vector<32x48xf32> -> vector<32x48xf32>
    %78 = arith.addf %71, %77 : vector<32x48xf32>
    %c0_56 = arith.constant 0 : index
    %c14 = arith.constant 14 : index
    %c0_57 = arith.constant 0 : index
    %79 = vector.load %arg8[%c0_56, %c14, %c0_57] : memref<2x32x32xf32, #tpu.memory_space<vmem>>, vector<2x16x32xf32>
    %80 = vector.shape_cast %79 : vector<2x16x32xf32> to vector<32x32xf32>
    %81 = arith.truncf %80 : vector<32x32xf32> to vector<32x32xbf16>
    %c8_58 = arith.constant 8 : index
    %c0_59 = arith.constant 0 : index
    %c0_60 = arith.constant 0 : index
    %82 = vector.load %arg4[%c8_58, %c0_59, %c0_60] : memref<11x32x48xbf16, #tpu.memory_space<vmem>>, vector<1x32x48xbf16>
    %83 = vector.shape_cast %82 : vector<1x32x48xbf16> to vector<32x48xbf16>
    %cst_61 = arith.constant dense<0.000000e+00> : vector<32x48xf32>
    %84 = tpu.matmul %81, %83, %cst_61 {dimension_numbers = #tpu.dot_dimension_numbers<[1], [0], [0], [1], [0, 0, 1, 1], [], []>} : vector<32x32xbf16>, vector<32x48xbf16>, vector<32x48xf32> -> vector<32x48xf32>
    %85 = arith.addf %78, %84 : vector<32x48xf32>
    %c0_62 = arith.constant 0 : index
    %c15 = arith.constant 15 : index
    %c0_63 = arith.constant 0 : index
    %86 = vector.load %arg8[%c0_62, %c15, %c0_63] : memref<2x32x32xf32, #tpu.memory_space<vmem>>, vector<2x16x32xf32>
    %87 = vector.shape_cast %86 : vector<2x16x32xf32> to vector<32x32xf32>
    %88 = arith.truncf %87 : vector<32x32xf32> to vector<32x32xbf16>
    %c9_64 = arith.constant 9 : index
    %c0_65 = arith.constant 0 : index
    %c0_66 = arith.constant 0 : index
    %89 = vector.load %arg4[%c9_64, %c0_65, %c0_66] : memref<11x32x48xbf16, #tpu.memory_space<vmem>>, vector<1x32x48xbf16>
    %90 = vector.shape_cast %89 : vector<1x32x48xbf16> to vector<32x48xbf16>
    %cst_67 = arith.constant dense<0.000000e+00> : vector<32x48xf32>
    %91 = tpu.matmul %88, %90, %cst_67 {dimension_numbers = #tpu.dot_dimension_numbers<[1], [0], [0], [1], [0, 0, 1, 1], [], []>} : vector<32x32xbf16>, vector<32x48xbf16>, vector<32x48xf32> -> vector<32x48xf32>
    %92 = arith.addf %85, %91 : vector<32x48xf32>
    %c0_68 = arith.constant 0 : index
    %c16_69 = arith.constant 16 : index
    %c0_70 = arith.constant 0 : index
    %93 = vector.load %arg8[%c0_68, %c16_69, %c0_70] : memref<2x32x32xf32, #tpu.memory_space<vmem>>, vector<2x16x32xf32>
    %94 = vector.shape_cast %93 : vector<2x16x32xf32> to vector<32x32xf32>
    %95 = arith.truncf %94 : vector<32x32xf32> to vector<32x32xbf16>
    %c10_71 = arith.constant 10 : index
    %c0_72 = arith.constant 0 : index
    %c0_73 = arith.constant 0 : index
    %96 = vector.load %arg4[%c10_71, %c0_72, %c0_73] : memref<11x32x48xbf16, #tpu.memory_space<vmem>>, vector<1x32x48xbf16>
    %97 = vector.shape_cast %96 : vector<1x32x48xbf16> to vector<32x48xbf16>
    %cst_74 = arith.constant dense<0.000000e+00> : vector<32x48xf32>
    %98 = tpu.matmul %95, %97, %cst_74 {dimension_numbers = #tpu.dot_dimension_numbers<[1], [0], [0], [1], [0, 0, 1, 1], [], []>} : vector<32x32xbf16>, vector<32x48xbf16>, vector<32x48xf32> -> vector<32x48xf32>
    %99 = arith.addf %92, %98 : vector<32x48xf32>
    %100 = vector.broadcast %2 : vector<1x48xf32> to vector<32x48xf32>
    %101 = arith.addf %99, %100 : vector<32x48xf32>
    %102 = arith.negf %101 : vector<32x48xf32>
    %103 = math.exp %102 : vector<32x48xf32>
    %cst_75 = arith.constant 1.000000e+00 : f32
    %104 = vector.broadcast %cst_75 : f32 to vector<32x48xf32>
    %105 = arith.addf %104, %103 : vector<32x48xf32>
    %106 = arith.divf %104, %105 : vector<32x48xf32>
    %107 = arith.mulf %101, %106 : vector<32x48xf32>
    %cst_76 = arith.constant 0.000000e+00 : f32
    %108 = vector.broadcast %cst_76 : f32 to vector<2x8x48xf32>
    %c0_77 = arith.constant 0 : index
    %c0_78 = arith.constant 0 : index
    %c0_79 = arith.constant 0 : index
    %109 = vector.load %arg9[%c0_77, %c0_78, %c0_79] : memref<2x32x48xf32, #tpu.memory_space<vmem>>, vector<2x8x48xf32>
    tpu.vector_store %arg9[%c0_77, %c0_78, %c0_79], %108 {strides = array<i32>} : memref<2x32x48xf32, #tpu.memory_space<vmem>>, vector<2x8x48xf32>,
    %110 = vector.shape_cast %107 : vector<32x48xf32> to vector<2x16x48xf32>
    %c0_80 = arith.constant 0 : index
    %c8_81 = arith.constant 8 : index
    %c0_82 = arith.constant 0 : index
    %111 = vector.load %arg9[%c0_80, %c8_81, %c0_82] : memref<2x32x48xf32, #tpu.memory_space<vmem>>, vector<2x16x48xf32>
    tpu.vector_store %arg9[%c0_80, %c8_81, %c0_82], %110 {strides = array<i32>} : memref<2x32x48xf32, #tpu.memory_space<vmem>>, vector<2x16x48xf32>,
    %cst_83 = arith.constant 0.000000e+00 : f32
    %112 = vector.broadcast %cst_83 : f32 to vector<2x8x48xf32>
    %c0_84 = arith.constant 0 : index
    %c24 = arith.constant 24 : index
    %c0_85 = arith.constant 0 : index
    %113 = vector.load %arg9[%c0_84, %c24, %c0_85] : memref<2x32x48xf32, #tpu.memory_space<vmem>>, vector<2x8x48xf32>
    tpu.vector_store %arg9[%c0_84, %c24, %c0_85], %112 {strides = array<i32>} : memref<2x32x48xf32, #tpu.memory_space<vmem>>, vector<2x8x48xf32>,
    %cst_86 = arith.constant 0.000000e+00 : f32
    %114 = vector.broadcast %cst_86 : f32 to vector<32x16xf32>
    %c0_87 = arith.constant 0 : index
    %c0_88 = arith.constant 0 : index
    %c0_89 = arith.constant 0 : index
    %115 = vector.load %arg9[%c0_87, %c0_88, %c0_89] : memref<2x32x48xf32, #tpu.memory_space<vmem>>, vector<2x16x48xf32>
    %116 = vector.shape_cast %115 : vector<2x16x48xf32> to vector<32x48xf32>
    %117 = arith.truncf %116 : vector<32x48xf32> to vector<32x48xbf16>
    %c0_90 = arith.constant 0 : index
    %c0_91 = arith.constant 0 : index
    %c0_92 = arith.constant 0 : index
    %118 = vector.load %arg5[%c0_90, %c0_91, %c0_92] : memref<11x48x16xbf16, #tpu.memory_space<vmem>>, vector<1x48x16xbf16>
    %119 = vector.shape_cast %118 : vector<1x48x16xbf16> to vector<48x16xbf16>
    %cst_93 = arith.constant dense<0.000000e+00> : vector<32x16xf32>
    %120 = tpu.matmul %117, %119, %cst_93 {dimension_numbers = #tpu.dot_dimension_numbers<[1], [0], [0], [1], [0, 0, 1, 1], [], []>} : vector<32x48xbf16>, vector<48x16xbf16>, vector<32x16xf32> -> vector<32x16xf32>
    %121 = arith.addf %114, %120 : vector<32x16xf32>
    %c0_94 = arith.constant 0 : index
    %c1_95 = arith.constant 1 : index
    %c0_96 = arith.constant 0 : index
    %122 = vector.load %arg9[%c0_94, %c1_95, %c0_96] : memref<2x32x48xf32, #tpu.memory_space<vmem>>, vector<2x16x48xf32>
    %123 = vector.shape_cast %122 : vector<2x16x48xf32> to vector<32x48xf32>
    %124 = arith.truncf %123 : vector<32x48xf32> to vector<32x48xbf16>
    %c1_97 = arith.constant 1 : index
    %c0_98 = arith.constant 0 : index
    %c0_99 = arith.constant 0 : index
    %125 = vector.load %arg5[%c1_97, %c0_98, %c0_99] : memref<11x48x16xbf16, #tpu.memory_space<vmem>>, vector<1x48x16xbf16>
    %126 = vector.shape_cast %125 : vector<1x48x16xbf16> to vector<48x16xbf16>
    %cst_100 = arith.constant dense<0.000000e+00> : vector<32x16xf32>
    %127 = tpu.matmul %124, %126, %cst_100 {dimension_numbers = #tpu.dot_dimension_numbers<[1], [0], [0], [1], [0, 0, 1, 1], [], []>} : vector<32x48xbf16>, vector<48x16xbf16>, vector<32x16xf32> -> vector<32x16xf32>
    %128 = arith.addf %121, %127 : vector<32x16xf32>
    %c0_101 = arith.constant 0 : index
    %c2_102 = arith.constant 2 : index
    %c0_103 = arith.constant 0 : index
    %129 = vector.load %arg9[%c0_101, %c2_102, %c0_103] : memref<2x32x48xf32, #tpu.memory_space<vmem>>, vector<2x16x48xf32>
    %130 = vector.shape_cast %129 : vector<2x16x48xf32> to vector<32x48xf32>
    %131 = arith.truncf %130 : vector<32x48xf32> to vector<32x48xbf16>
    %c2_104 = arith.constant 2 : index
    %c0_105 = arith.constant 0 : index
    %c0_106 = arith.constant 0 : index
    %132 = vector.load %arg5[%c2_104, %c0_105, %c0_106] : memref<11x48x16xbf16, #tpu.memory_space<vmem>>, vector<1x48x16xbf16>
    %133 = vector.shape_cast %132 : vector<1x48x16xbf16> to vector<48x16xbf16>
    %cst_107 = arith.constant dense<0.000000e+00> : vector<32x16xf32>
    %134 = tpu.matmul %131, %133, %cst_107 {dimension_numbers = #tpu.dot_dimension_numbers<[1], [0], [0], [1], [0, 0, 1, 1], [], []>} : vector<32x48xbf16>, vector<48x16xbf16>, vector<32x16xf32> -> vector<32x16xf32>
    %135 = arith.addf %128, %134 : vector<32x16xf32>
    %c0_108 = arith.constant 0 : index
    %c3_109 = arith.constant 3 : index
    %c0_110 = arith.constant 0 : index
    %136 = vector.load %arg9[%c0_108, %c3_109, %c0_110] : memref<2x32x48xf32, #tpu.memory_space<vmem>>, vector<2x16x48xf32>
    %137 = vector.shape_cast %136 : vector<2x16x48xf32> to vector<32x48xf32>
    %138 = arith.truncf %137 : vector<32x48xf32> to vector<32x48xbf16>
    %c3_111 = arith.constant 3 : index
    %c0_112 = arith.constant 0 : index
    %c0_113 = arith.constant 0 : index
    %139 = vector.load %arg5[%c3_111, %c0_112, %c0_113] : memref<11x48x16xbf16, #tpu.memory_space<vmem>>, vector<1x48x16xbf16>
    %140 = vector.shape_cast %139 : vector<1x48x16xbf16> to vector<48x16xbf16>
    %cst_114 = arith.constant dense<0.000000e+00> : vector<32x16xf32>
    %141 = tpu.matmul %138, %140, %cst_114 {dimension_numbers = #tpu.dot_dimension_numbers<[1], [0], [0], [1], [0, 0, 1, 1], [], []>} : vector<32x48xbf16>, vector<48x16xbf16>, vector<32x16xf32> -> vector<32x16xf32>
    %142 = arith.addf %135, %141 : vector<32x16xf32>
    %c0_115 = arith.constant 0 : index
    %c4_116 = arith.constant 4 : index
    %c0_117 = arith.constant 0 : index
    %143 = vector.load %arg9[%c0_115, %c4_116, %c0_117] : memref<2x32x48xf32, #tpu.memory_space<vmem>>, vector<2x16x48xf32>
    %144 = vector.shape_cast %143 : vector<2x16x48xf32> to vector<32x48xf32>
    %145 = arith.truncf %144 : vector<32x48xf32> to vector<32x48xbf16>
    %c4_118 = arith.constant 4 : index
    %c0_119 = arith.constant 0 : index
    %c0_120 = arith.constant 0 : index
    %146 = vector.load %arg5[%c4_118, %c0_119, %c0_120] : memref<11x48x16xbf16, #tpu.memory_space<vmem>>, vector<1x48x16xbf16>
    %147 = vector.shape_cast %146 : vector<1x48x16xbf16> to vector<48x16xbf16>
    %cst_121 = arith.constant dense<0.000000e+00> : vector<32x16xf32>
    %148 = tpu.matmul %145, %147, %cst_121 {dimension_numbers = #tpu.dot_dimension_numbers<[1], [0], [0], [1], [0, 0, 1, 1], [], []>} : vector<32x48xbf16>, vector<48x16xbf16>, vector<32x16xf32> -> vector<32x16xf32>
    %149 = arith.addf %142, %148 : vector<32x16xf32>
    %c0_122 = arith.constant 0 : index
    %c5_123 = arith.constant 5 : index
    %c0_124 = arith.constant 0 : index
    %150 = vector.load %arg9[%c0_122, %c5_123, %c0_124] : memref<2x32x48xf32, #tpu.memory_space<vmem>>, vector<2x16x48xf32>
    %151 = vector.shape_cast %150 : vector<2x16x48xf32> to vector<32x48xf32>
    %152 = arith.truncf %151 : vector<32x48xf32> to vector<32x48xbf16>
    %c5_125 = arith.constant 5 : index
    %c0_126 = arith.constant 0 : index
    %c0_127 = arith.constant 0 : index
    %153 = vector.load %arg5[%c5_125, %c0_126, %c0_127] : memref<11x48x16xbf16, #tpu.memory_space<vmem>>, vector<1x48x16xbf16>
    %154 = vector.shape_cast %153 : vector<1x48x16xbf16> to vector<48x16xbf16>
    %cst_128 = arith.constant dense<0.000000e+00> : vector<32x16xf32>
    %155 = tpu.matmul %152, %154, %cst_128 {dimension_numbers = #tpu.dot_dimension_numbers<[1], [0], [0], [1], [0, 0, 1, 1], [], []>} : vector<32x48xbf16>, vector<48x16xbf16>, vector<32x16xf32> -> vector<32x16xf32>
    %156 = arith.addf %149, %155 : vector<32x16xf32>
    %c0_129 = arith.constant 0 : index
    %c6_130 = arith.constant 6 : index
    %c0_131 = arith.constant 0 : index
    %157 = vector.load %arg9[%c0_129, %c6_130, %c0_131] : memref<2x32x48xf32, #tpu.memory_space<vmem>>, vector<2x16x48xf32>
    %158 = vector.shape_cast %157 : vector<2x16x48xf32> to vector<32x48xf32>
    %159 = arith.truncf %158 : vector<32x48xf32> to vector<32x48xbf16>
    %c6_132 = arith.constant 6 : index
    %c0_133 = arith.constant 0 : index
    %c0_134 = arith.constant 0 : index
    %160 = vector.load %arg5[%c6_132, %c0_133, %c0_134] : memref<11x48x16xbf16, #tpu.memory_space<vmem>>, vector<1x48x16xbf16>
    %161 = vector.shape_cast %160 : vector<1x48x16xbf16> to vector<48x16xbf16>
    %cst_135 = arith.constant dense<0.000000e+00> : vector<32x16xf32>
    %162 = tpu.matmul %159, %161, %cst_135 {dimension_numbers = #tpu.dot_dimension_numbers<[1], [0], [0], [1], [0, 0, 1, 1], [], []>} : vector<32x48xbf16>, vector<48x16xbf16>, vector<32x16xf32> -> vector<32x16xf32>
    %163 = arith.addf %156, %162 : vector<32x16xf32>
    %c0_136 = arith.constant 0 : index
    %c7_137 = arith.constant 7 : index
    %c0_138 = arith.constant 0 : index
    %164 = vector.load %arg9[%c0_136, %c7_137, %c0_138] : memref<2x32x48xf32, #tpu.memory_space<vmem>>, vector<2x16x48xf32>
    %165 = vector.shape_cast %164 : vector<2x16x48xf32> to vector<32x48xf32>
    %166 = arith.truncf %165 : vector<32x48xf32> to vector<32x48xbf16>
    %c7_139 = arith.constant 7 : index
    %c0_140 = arith.constant 0 : index
    %c0_141 = arith.constant 0 : index
    %167 = vector.load %arg5[%c7_139, %c0_140, %c0_141] : memref<11x48x16xbf16, #tpu.memory_space<vmem>>, vector<1x48x16xbf16>
    %168 = vector.shape_cast %167 : vector<1x48x16xbf16> to vector<48x16xbf16>
    %cst_142 = arith.constant dense<0.000000e+00> : vector<32x16xf32>
    %169 = tpu.matmul %166, %168, %cst_142 {dimension_numbers = #tpu.dot_dimension_numbers<[1], [0], [0], [1], [0, 0, 1, 1], [], []>} : vector<32x48xbf16>, vector<48x16xbf16>, vector<32x16xf32> -> vector<32x16xf32>
    %170 = arith.addf %163, %169 : vector<32x16xf32>
    %c0_143 = arith.constant 0 : index
    %c8_144 = arith.constant 8 : index
    %c0_145 = arith.constant 0 : index
    %171 = vector.load %arg9[%c0_143, %c8_144, %c0_145] : memref<2x32x48xf32, #tpu.memory_space<vmem>>, vector<2x16x48xf32>
    %172 = vector.shape_cast %171 : vector<2x16x48xf32> to vector<32x48xf32>
    %173 = arith.truncf %172 : vector<32x48xf32> to vector<32x48xbf16>
    %c8_146 = arith.constant 8 : index
    %c0_147 = arith.constant 0 : index
    %c0_148 = arith.constant 0 : index
    %174 = vector.load %arg5[%c8_146, %c0_147, %c0_148] : memref<11x48x16xbf16, #tpu.memory_space<vmem>>, vector<1x48x16xbf16>
    %175 = vector.shape_cast %174 : vector<1x48x16xbf16> to vector<48x16xbf16>
    %cst_149 = arith.constant dense<0.000000e+00> : vector<32x16xf32>
    %176 = tpu.matmul %173, %175, %cst_149 {dimension_numbers = #tpu.dot_dimension_numbers<[1], [0], [0], [1], [0, 0, 1, 1], [], []>} : vector<32x48xbf16>, vector<48x16xbf16>, vector<32x16xf32> -> vector<32x16xf32>
    %177 = arith.addf %170, %176 : vector<32x16xf32>
    %c0_150 = arith.constant 0 : index
    %c9_151 = arith.constant 9 : index
    %c0_152 = arith.constant 0 : index
    %178 = vector.load %arg9[%c0_150, %c9_151, %c0_152] : memref<2x32x48xf32, #tpu.memory_space<vmem>>, vector<2x16x48xf32>
    %179 = vector.shape_cast %178 : vector<2x16x48xf32> to vector<32x48xf32>
    %180 = arith.truncf %179 : vector<32x48xf32> to vector<32x48xbf16>
    %c9_153 = arith.constant 9 : index
    %c0_154 = arith.constant 0 : index
    %c0_155 = arith.constant 0 : index
    %181 = vector.load %arg5[%c9_153, %c0_154, %c0_155] : memref<11x48x16xbf16, #tpu.memory_space<vmem>>, vector<1x48x16xbf16>
    %182 = vector.shape_cast %181 : vector<1x48x16xbf16> to vector<48x16xbf16>
    %cst_156 = arith.constant dense<0.000000e+00> : vector<32x16xf32>
    %183 = tpu.matmul %180, %182, %cst_156 {dimension_numbers = #tpu.dot_dimension_numbers<[1], [0], [0], [1], [0, 0, 1, 1], [], []>} : vector<32x48xbf16>, vector<48x16xbf16>, vector<32x16xf32> -> vector<32x16xf32>
    %184 = arith.addf %177, %183 : vector<32x16xf32>
    %c0_157 = arith.constant 0 : index
    %c10_158 = arith.constant 10 : index
    %c0_159 = arith.constant 0 : index
    %185 = vector.load %arg9[%c0_157, %c10_158, %c0_159] : memref<2x32x48xf32, #tpu.memory_space<vmem>>, vector<2x16x48xf32>
    %186 = vector.shape_cast %185 : vector<2x16x48xf32> to vector<32x48xf32>
    %187 = arith.truncf %186 : vector<32x48xf32> to vector<32x48xbf16>
    %c10_160 = arith.constant 10 : index
    %c0_161 = arith.constant 0 : index
    %c0_162 = arith.constant 0 : index
    %188 = vector.load %arg5[%c10_160, %c0_161, %c0_162] : memref<11x48x16xbf16, #tpu.memory_space<vmem>>, vector<1x48x16xbf16>
    %189 = vector.shape_cast %188 : vector<1x48x16xbf16> to vector<48x16xbf16>
    %cst_163 = arith.constant dense<0.000000e+00> : vector<32x16xf32>
    %190 = tpu.matmul %187, %189, %cst_163 {dimension_numbers = #tpu.dot_dimension_numbers<[1], [0], [0], [1], [0, 0, 1, 1], [], []>} : vector<32x48xbf16>, vector<48x16xbf16>, vector<32x16xf32> -> vector<32x16xf32>
    %191 = arith.addf %184, %190 : vector<32x16xf32>
    %c0_164 = arith.constant 0 : index
    %c0_165 = arith.constant 0 : index
    %192 = vector.load %arg3[%c0_164, %c0_165] : memref<16x32xf32, #tpu.memory_space<vmem>>, vector<16x32xf32>
    %cst_166 = arith.constant dense<0.000000e+00> : vector<16x16xf32>
    %193 = tpu.matmul %192, %191, %cst_166 {dimension_numbers = #tpu.dot_dimension_numbers<[1], [0], [0], [1], [0, 0, 1, 1], [], []>} : vector<16x32xf32>, vector<32x16xf32>, vector<16x16xf32> -> vector<16x16xf32>
    %194 = vector.broadcast %3 : vector<1x16xf32> to vector<16x16xf32>
    %195 = arith.addf %193, %194 : vector<16x16xf32>
    %196 = arith.negf %195 : vector<16x16xf32>
    %197 = math.exp %196 : vector<16x16xf32>
    %cst_167 = arith.constant 1.000000e+00 : f32
    %198 = vector.broadcast %cst_167 : f32 to vector<16x16xf32>
    %199 = arith.addf %198, %197 : vector<16x16xf32>
    %200 = arith.divf %198, %199 : vector<16x16xf32>
    %201 = arith.mulf %195, %200 : vector<16x16xf32>
    %202 = arith.truncf %201 : vector<16x16xf32> to vector<16x16xbf16>
    %c0_168 = arith.constant 0 : index
    %c0_169 = arith.constant 0 : index
    %203 = vector.load %arg6[%c0_168, %c0_169] : memref<16x32xbf16, #tpu.memory_space<vmem>>, vector<16x32xbf16>
    %cst_170 = arith.constant dense<0.000000e+00> : vector<16x32xf32>
    %204 = tpu.matmul %202, %203, %cst_170 {dimension_numbers = #tpu.dot_dimension_numbers<[1], [0], [0], [1], [0, 0, 1, 1], [], []>} : vector<16x16xbf16>, vector<16x32xbf16>, vector<16x32xf32> -> vector<16x32xf32>
    %205 = arith.mulf %204, %204 : vector<16x32xf32>
    %cst_171 = arith.constant dense<0.000000e+00> : vector<16xf32>
    %206 = vector.multi_reduction <add>, %205, %cst_171 [1] : vector<16x32xf32> to vector<16xf32>
    %207 = vector.shape_cast %206 : vector<16xf32> to vector<16x1xf32>
    %cst_172 = arith.constant 3.200000e+01 : f32
    %208 = vector.broadcast %cst_172 : f32 to vector<16x1xf32>
    %209 = arith.divf %207, %208 : vector<16x1xf32>
    %cst_173 = arith.constant 9.99999997E-7 : f32
    %210 = vector.broadcast %cst_173 : f32 to vector<16x1xf32>
    %211 = arith.addf %209, %210 : vector<16x1xf32>
    %212 = math.rsqrt %211 : vector<16x1xf32>
    %213 = vector.broadcast %212 : vector<16x1xf32> to vector<16x32xf32>
    %214 = arith.mulf %204, %213 : vector<16x32xf32>
    %215 = vector.broadcast %4 : vector<1x32xf32> to vector<16x32xf32>
    %216 = arith.mulf %214, %215 : vector<16x32xf32>
    %217 = vector.shape_cast %216 : vector<16x32xf32> to vector<2x8x32xf32>
    %218 = vector.extract_strided_slice %217 {offsets = [0, 0, 0], sizes = [2, 5, 32], strides = [1, 1, 1]} : vector<2x8x32xf32> to vector<2x5x32xf32>
    %c0_174 = arith.constant 0 : index
    %c0_175 = arith.constant 0 : index
    %c0_176 = arith.constant 0 : index
    %219 = vector.load %arg7[%c0_174, %c0_175, %c0_176] : memref<2x5x32xf32, #tpu.memory_space<vmem>>, vector<2x5x32xf32>
    tpu.vector_store %arg7[%c0_174, %c0_175, %c0_176], %218 {strides = array<i32>} : memref<2x5x32xf32, #tpu.memory_space<vmem>>, vector<2x5x32xf32>,
    return
  }
  func.func @transform_0(%arg0: i32) -> (i32, i32, i32) {
    %c0_i32 = arith.constant 0 : i32
    %c0_i32_0 = arith.constant 0 : i32
    %c0_i32_1 = arith.constant 0 : i32
    return %arg0, %c0_i32, %c0_i32_0 : i32, i32, i32
  }
  func.func @transform_1(%arg0: i32) -> (i32, i32) {
    %c0_i32 = arith.constant 0 : i32
    %c0_i32_0 = arith.constant 0 : i32
    %c0_i32_1 = arith.constant 0 : i32
    return %c0_i32, %c0_i32_0 : i32, i32
  }
  func.func @transform_2(%arg0: i32) -> (i32, i32) {
    %c0_i32 = arith.constant 0 : i32
    %c0_i32_0 = arith.constant 0 : i32
    %c0_i32_1 = arith.constant 0 : i32
    return %c0_i32, %c0_i32_0 : i32, i32
  }
  func.func @transform_3(%arg0: i32) -> (i32, i32, i32) {
    %c0_i32 = arith.constant 0 : i32
    %c0_i32_0 = arith.constant 0 : i32
    %c0_i32_1 = arith.constant 0 : i32
    %c0_i32_2 = arith.constant 0 : i32
    return %c0_i32, %c0_i32_0, %c0_i32_1 : i32, i32, i32
  }
  func.func @transform_4(%arg0: i32) -> (i32, i32, i32) {
    %c0_i32 = arith.constant 0 : i32
    %c0_i32_0 = arith.constant 0 : i32
    %c0_i32_1 = arith.constant 0 : i32
    %c0_i32_2 = arith.constant 0 : i32
    return %c0_i32, %c0_i32_0, %c0_i32_1 : i32, i32, i32
  }
  func.func @transform_5(%arg0: i32) -> (i32, i32) {
    %c0_i32 = arith.constant 0 : i32
    %c0_i32_0 = arith.constant 0 : i32
    %c0_i32_1 = arith.constant 0 : i32
    return %c0_i32, %c0_i32_0 : i32, i32
  }
  func.func @transform_6(%arg0: i32) -> (i32, i32, i32) {
    %c0_i32 = arith.constant 0 : i32
    %c0_i32_0 = arith.constant 0 : i32
    %c0_i32_1 = arith.constant 0 : i32
    return %arg0, %c0_i32, %c0_i32_0 : i32, i32, i32
  }
}

</mosaic_0001>

<bundles_post_ra>
// kernel: tpu_custom_call.1
= control target key start
LH: loop header
LB: loop body
LE: loop exit
PB: predicated region body
PF: predicated region fallthrough
CT: control target
= control target key end

     0   :  { %vm33_vm0 = vcmask 261120   ;;  %v2055_v12 = vmov 32.0   ;;  %s2056_s30 = smov 96   ;;  %v2057_v19 = vmov 0.0   ;;  %vm770_vm14 = vcmask 392192   ;;  %s2058_s15 = smov 48   ;;  %s2488_s0 = inlined_call_operand.vmem [shape: f32[2,16,32], index: 0, kind: input, shape index: {}]   ;;  %s2489_s1 = inlined_call_operand.vmem [shape: f32[1,128], index: 1, kind: input, shape index: {}]   ;;  %s2490_s3 = inlined_call_operand.vmem [shape: bf16[11,32,48], index: 3, kind: input, shape index: {}]   ;;  %s2491_s4 = inlined_call_operand.vmem [shape: bf16[11,48,16], index: 4, kind: input, shape index: {}]   ;;  %s2492_s2 = inlined_call_operand.vmem [shape: f32[16,32], index: 2, kind: input, shape index: {}]   ;;  %s2493_s5 = inlined_call_operand.vmem [shape: bf16[16,32], index: 5, kind: input, shape index: {}]   ;;  %s2494_s6 = inlined_call_operand.vmem [shape: f32[2,5,32], index: 6, kind: output, shape index: {}]  }
   0x1   :  { %v2098_v0 = vld [vmem:[%s2488_s0 + $0x8] sm:$0xff]  ;;  %v2103_v1 = vld [vmem:[%s2488_s0] sm:$0xff]  ;;  %v2112_v4 = vld [vmem:[%s2488_s0 + $0x18] sm:$0xff]  ;;  %2016 = vrcp.f32 %v2055_v12  ;;  %112 = vst.msk [vmem:[#allocation2] sm:$0xff] %vm33_vm0, %v2057_v19 }
   0x2   :  { %v30_v2 = vmul.f32 %v2098_v0, %v2098_v0  ;;  %v29_v3 = vmul.f32 %v2103_v1, %v2103_v1  ;;  %v2117_v5 = vld [vmem:[%s2488_s0 + $0x10] sm:$0xff]  ;;  %v32_v8 = vmul.f32 %v2112_v4, %v2112_v4  ;;  %v2130_v17 = vld [vmem:[%s2489_s1] ss:$0 sm:$0xff]  ;;  %v1957_v20 = vld [vmem:[%s2490_s3 + $0x18] sm:$0xff]  ;;  %113 = vst.msk [vmem:[#allocation2 + $0x8] sm:$0xff] %vm33_vm0, %v2057_v19 }
   0x3   :  { %v31_v9 = vmul.f32 %v2117_v5, %v2117_v5  ;;  %683 = vrot.lane.b32.xlu2 %v2130_v17, %s2056_s30  ;;  %v1955_v21 = vld [vmem:[%s2490_s3 + $0x8] sm:$0xff]  ;;  %v1961_v24 = vld [vmem:[%s2490_s3 + $0x38] sm:$0xff]  ;;  %114 = vst.msk [vmem:[#allocation2 + $0x20] sm:$0xff] %vm33_vm0, %v2057_v19  ;;  %165 = vmatpush.bf16.msra.mxu0 %v1957_v20  ;;  %v1956_v29 = vld [vmem:[%s2490_s3 + $0x10] sm:$0xff] }
   0x4   :  { %v37_v6 = vsel %vm33_vm0, %v30_v2, 0.0  ;;  %v34_v7 = vsel %vm33_vm0, %v29_v3, 0.0  ;;  %v43_v10 = vsel %vm33_vm0, %v32_v8, 0.0  ;;  %v1959_v22 = vld [vmem:[%s2490_s3 + $0x28] sm:$0xff]  ;;  %202 = vmatpush.bf16.msra.mxu1 %v1955_v21  ;;  %115 = vst.msk [vmem:[#allocation2 + $0x28] sm:$0xff] %vm33_vm0, %v2057_v19  ;;  %302 = vmatpush.bf16.msra.mxu3 %v1961_v24  ;;  %v1954_v30 = vld [vmem:[%s2490_s3] sm:$0xff] }
   0x5   :  { %38 = vadd.xlane.f32.xlu1 %v37_v6  ;;  %35 = vadd.xlane.f32.xlu0 %v34_v7  ;;  %v40_v11 = vsel %vm33_vm0, %v31_v9, 0.0  ;;  %v1958_v31 = vld [vmem:[%s2490_s3 + $0x20] sm:$0xff]  ;;  %v1960_v32 = vld [vmem:[%s2490_s3 + $0x30] sm:$0xff]  ;;  %v1963_v62 = vld [vmem:[%s2490_s3 + $0x48] sm:$0xff]  ;;  %771 = vst.msk [vmem:[#allocation3] sm:$0xff] %vm770_vm14, %v2057_v19 }
   0x6   :  { %250 = vmatpush.bf16.msra.mxu2 %v1959_v22  ;;  %v1965_v63 = vld [vmem:[%s2490_s3 + $0x58] sm:$0xff]  ;;  %v1967_v2 = vld [vmem:[%s2490_s3 + $0x68] sm:$0xff]  ;;  %v1962_v9 = vld [vmem:[%s2490_s3 + $0x40] sm:$0xff]  ;;  %772 = vst.msk [vmem:[#allocation3 + $0x20] sm:$0xff] %vm770_vm14, %v2057_v19 }
   0x7   :  { %v2017_v13 = vpop.eup %2016  ;;  %166 = vmatpush.bf16.msra.mxu0 %v1956_v29  ;;  %v1966_v12 = vld [vmem:[%s2490_s3 + $0x60] sm:$0xff]  ;;  %777 = vst.msk [vmem:[#allocation3 + $0x18] sm:$0xff] %vm770_vm14, %v2057_v19 }
   0x8   :  { %v47_v14 = vmul.f32 32.0, %v2017_v13  ;;  %vm51_vm1 = vweird.f32 %v2017_v13  ;;  %203 = vmatpush.bf16.msra.mxu1 %v1954_v30  ;;  %303 = vmatpush.bf16.msra.mxu3 %v1960_v32  ;;  %778 = vst.msk [vmem:[#allocation3 + $0x38] sm:$0xff] %vm770_vm14, %v2057_v19 }
   0xa   :  { %v48_v15 = vsub.f32 1.0, %v47_v14  ;;  %251 = vmatpush.bf16.msra.mxu2 %v1958_v31 }
   0xb   :  { %354 = vmatpush.bf16.msrb.mxu0 %v1963_v62 }
   0xc   :  { %v49_v16 = vmul.f32 %v2017_v13, %v48_v15  ;;  %406 = vmatpush.bf16.msrb.mxu1 %v1965_v63 }
   0xd   :  { %44 = vadd.xlane.f32.xlu1 %v43_v10  ;;  %41 = vadd.xlane.f32.xlu0 %v40_v11 }
   0xe   :  { %v50_v18 = vadd.f32 %v2017_v13, %v49_v16  ;;  %458 = vmatpush.bf16.msrb.mxu2 %v1967_v2 }
   0xf   :  { %355 = vmatpush.bf16.msrb.mxu0 %v1962_v9 }
  0x10   :  { %v2146_v23 = vsel %vm51_vm1, %v2017_v13, %v50_v18  ;;  %v1968_v13 = vld [vmem:[%s2490_s3 + $0x70] sm:$0xff] }
  0x12   :  { %459 = vmatpush.bf16.msrb.mxu2 %v1966_v12 }
  0x78   :  { %v39_v25 = vpop.xlane.xlu1 %38  ;;  %v36_v26 = vpop.xlane.xlu0 %35 }
  0x79   :  { %v54_v27 = vmul.f32 %v2146_v23, %v39_v25  ;;  %v53_v28 = vmul.f32 %v2146_v23, %v36_v26  ;;  %v130_v25 = vld [vmem:[#allocation2 + $0x7] sm:$0xff] }
  0x7a   :  { %v120_v26 = vld [vmem:[#allocation2 + $0x6] sm:$0xff] }
  0x7b   :  { %v58_v33 = vadd.f32 1e-06, %v54_v27  ;;  %v57_v34 = vadd.f32 1e-06, %v53_v28  ;;  %v215_v27 = vld [vmem:[#allocation2 + $0x8] sm:$0xff] }
  0x7d   :  { %2018 = vrsqrt.f32 %v58_v33  ;;  %vm77_vm2 = vweird.f32 %v58_v33  ;;  %vm67_vm6 = vweird.f32 %v57_v34 }
  0x7e   :  { %2020 = vrsqrt.f32 %v57_v34 }
  0x80   :  { %v45_v35 = vpop.xlane.xlu1 %44  ;;  %v42_v36 = vpop.xlane.xlu0 %41 }
  0x81   :  { %v56_v37 = vmul.f32 %v2146_v23, %v45_v35  ;;  %v55_v38 = vmul.f32 %v2146_v23, %v42_v36  ;;  %v122_v36 = vld [vmem:[#allocation2 + $0x26] sm:$0xff] }
  0x83   :  { %v2019_v39 = vpop.eup %2018  ;;  %v60_v40 = vadd.f32 1e-06, %v56_v37  ;;  %v59_v41 = vadd.f32 1e-06, %v55_v38 }
  0x84   :  { %v2021_v42 = vpop.eup %2020  ;;  %v72_v43 = vmul.f32 %v2019_v39, %v58_v33  ;;  %vm78_vm3 = vweird.f32 %v2019_v39 }
  0x85   :  { %v62_v44 = vmul.f32 %v2021_v42, %v57_v34  ;;  %2022 = vrsqrt.f32 %v60_v40  ;;  %vm79_vm4 = vmor %vm77_vm2, %vm78_vm3  ;;  %vm68_vm5 = vweird.f32 %v2021_v42  ;;  %vm97_vm8 = vweird.f32 %v60_v40 }
  0x86   :  { %v73_v45 = vmul.f32 %v2019_v39, %v72_v43  ;;  %2024 = vrsqrt.f32 %v59_v41  ;;  %vm69_vm7 = vmor %vm67_vm6, %vm68_vm5  ;;  %vm87_vm11 = vweird.f32 %v59_v41 }
  0x87   :  { %v63_v46 = vmul.f32 %v2021_v42, %v62_v44 }
  0x88   :  { %v74_v47 = vmul.f32 0.5, %v73_v45 }
  0x89   :  { %v64_v48 = vmul.f32 0.5, %v63_v46 }
  0x8a   :  { %v75_v49 = vsub.f32 1.5, %v74_v47  ;;  %v1971_v47 = vld [vmem:[%s2490_s3 + $0x88] sm:$0xff] }
  0x8b   :  { %v2023_v50 = vpop.eup %2022  ;;  %v65_v51 = vsub.f32 1.5, %v64_v48  ;;  %v1973_v48 = vld [vmem:[%s2490_s3 + $0x98] sm:$0xff] }
  0x8c   :  { %v2025_v52 = vpop.eup %2024  ;;  %v76_v53 = vmul.f32 %v2019_v39, %v75_v49  ;;  %v92_v54 = vmul.f32 %v2023_v50, %v60_v40  ;;  %vm98_vm9 = vweird.f32 %v2023_v50  ;;  %v1975_v49 = vld [vmem:[%s2490_s3 + $0xa8] sm:$0xff] }
  0x8d   :  { %v66_v55 = vmul.f32 %v2021_v42, %v65_v51  ;;  %v82_v56 = vmul.f32 %v2025_v52, %v59_v41  ;;  %vm99_vm10 = vmor %vm97_vm8, %vm98_vm9  ;;  %vm88_vm12 = vweird.f32 %v2025_v52  ;;  %v1972_v51 = vld [vmem:[%s2490_s3 + $0x90] sm:$0xff] }
  0x8e   :  { %v80_v57 = vsel %vm79_vm4, %v2019_v39, %v76_v53  ;;  %v93_v58 = vmul.f32 %v2023_v50, %v92_v54  ;;  %vm89_vm13 = vmor %vm87_vm11, %vm88_vm12  ;;  %v217_v39 = vld [vmem:[#allocation2 + $0x28] sm:$0xff] }
  0x8f   :  { %v102_v59 = vmul.f32 %v80_v57, %v2098_v0  ;;  %v70_v60 = vsel %vm69_vm7, %v2021_v42, %v66_v55  ;;  %v83_v61 = vmul.f32 %v2025_v52, %v82_v56  ;;  %v1969_v0 = vld [vmem:[%s2490_s3 + $0x78] sm:$0xff] }
  0x90   :  { %v101_v3 = vmul.f32 %v70_v60, %v2103_v1  ;;  %v94_v6 = vmul.f32 0.5, %v93_v58  ;;  %v1964_v1 = vld [vmem:[%s2490_s3 + $0x50] sm:$0xff]  ;;  %510 = vmatpush.bf16.msrb.mxu3 %v1969_v0 }
  0x91   :  { %v109_v7 = vmul.f32 %v2130_v17, %v102_v59  ;;  %v84_v8 = vmul.f32 0.5, %v83_v61  ;;  %407 = vmatpush.bf16.msrb.mxu1 %v1964_v1 }
  0x92   :  { %v108_v10 = vmul.f32 %v2130_v17, %v101_v3  ;;  %v95_v11 = vsub.f32 1.5, %v94_v6 }
  0x93   :  { %117 = vst.msk [vmem:[#allocation2 + $0x18] sm:$0xff] %vm33_vm0, %v109_v7  ;;  %v85_v14 = vsub.f32 1.5, %v84_v8 }
  0x94   :  { %116 = vst.msk [vmem:[#allocation2 + $0x10] sm:$0xff] %vm33_vm0, %v108_v10  ;;  %v96_v15 = vmul.f32 %v2023_v50, %v95_v11  ;;  %511 = vmatpush.bf16.msrb.mxu3 %v1968_v13 }
  0x95   :  { %v86_v16 = vmul.f32 %v2025_v52, %v85_v14 }
  0x96   :  { %v100_v18 = vsel %vm99_vm10, %v2023_v50, %v96_v15  ;;  %v1970_v50 = vld [vmem:[%s2490_s3 + $0x80] sm:$0xff] }
  0x97   :  { %v104_v20 = vmul.f32 %v100_v18, %v2112_v4  ;;  %v90_v21 = vsel %vm89_vm13, %v2025_v52, %v86_v16  ;;  %v1974_v52 = vld [vmem:[%s2490_s3 + $0xa0] sm:$0xff] }
  0x98   :  { %v103_v22 = vmul.f32 %v90_v21, %v2117_v5 }
  0x99   :  { %v111_v24 = vmul.f32 %v2130_v17, %v104_v20 }
  0x9a   :  { %v110_v28 = vmul.f32 %v2130_v17, %v103_v22  ;;  %v132_v17 = vld [vmem:[#allocation2 + $0x27] sm:$0xff]  ;;  %v632_v18 = vld [vmem:[#allocation2 + $0x18] sm:$0xff] }
  0x9b   :  { %119 = vst.msk [vmem:[#allocation2 + $0x38] sm:$0xff] %vm33_vm0, %v111_v24  ;;  %v2208_v29 = vld [vmem:[#allocation2 + $0xf] sm:$0xff]  ;;  %v580_v16 = vld [vmem:[#allocation2 + $0x17] sm:$0xff] }
  0x9c   :  { %v2210_v30 = vld [vmem:[#allocation2 + $0xe] sm:$0xff]  ;;  %118 = vst.msk [vmem:[#allocation2 + $0x30] sm:$0xff] %vm33_vm0, %v110_v28  ;;  %v134_v4 = vpack.c.bf16 %v2208_v29, %v130_v25  ;;  %v528_v15 = vld [vmem:[#allocation2 + $0x16] sm:$0xff]  ;;  %v583_v21 = vpack.c.bf16 %v580_v16, %v2208_v29 }
  0x9d   :  { %v2212_v31 = vld [vmem:[#allocation2 + $0x10] sm:$0xff]  ;;  %v124_v5 = vpack.c.bf16 %v2210_v30, %v120_v26  ;;  %v531_v20 = vpack.c.bf16 %v528_v15, %v2210_v30 }
  0x9e   :  { %v219_v32 = vpack.c.bf16 %v2212_v31, %v215_v27  ;;  %v267_v33 = vld [vmem:[#allocation2 + $0x9] sm:$0xff]  ;;  %v268_v34 = vld [vmem:[#allocation2 + $0x11] sm:$0xff]  ;;  %1589 = vmatmul.msk.bf16.vlgmr.msra.gmra.mxu0 %vm33_vm0, %v134_v4  ;;  %v635_v22 = vpack.c.bf16 %v632_v18, %v2212_v31  ;;  %v2281_v18 = vpop.permute.xlu2 %683 }
  0x9f   :  { %v271_v35 = vpack.c.bf16 %v268_v34, %v267_v33  ;;  %1599 = vmatmul.msk.bf16.vlgmr.msra.gmra.mxu1 %vm33_vm0, %v124_v5  ;;  %562 = vmatpush.bf16.msra.mxu0 %v1971_v47  ;;  %v319_v53 = vld [vmem:[#allocation2 + $0xa] sm:$0xff]  ;;  %v320_v54 = vld [vmem:[#allocation2 + $0x12] sm:$0xff] }
  0xa0   :  { %1613 = vmatmul.msk.bf16.vlgmr.msra.gmra.mxu2 %vm33_vm0, %v219_v32  ;;  %614 = vmatpush.bf16.msra.mxu1 %v1973_v48  ;;  %v371_v55 = vld [vmem:[#allocation2 + $0xb] sm:$0xff]  ;;  %v372_v56 = vld [vmem:[#allocation2 + $0x13] sm:$0xff]  ;;  %v323_v61 = vpack.c.bf16 %v320_v54, %v319_v53 }
  0xa1   :  { %1627 = vmatmul.msk.bf16.vlgmr.msra.gmra.mxu3 %vm33_vm0, %v271_v35  ;;  %666 = vmatpush.bf16.msra.mxu2 %v1975_v49  ;;  %v423_v57 = vld [vmem:[#allocation2 + $0xc] sm:$0xff]  ;;  %v424_v58 = vld [vmem:[#allocation2 + $0x14] sm:$0xff]  ;;  %v375_v62 = vpack.c.bf16 %v372_v56, %v371_v55 }
  0xa2   :  { %v475_v59 = vld [vmem:[#allocation2 + $0xd] sm:$0xff]  ;;  %v476_v60 = vld [vmem:[#allocation2 + $0x15] sm:$0xff]  ;;  %v427_v63 = vpack.c.bf16 %v424_v58, %v423_v57 }
  0xa3   :  { %v2222_v37 = vld [vmem:[#allocation2 + $0x2f] sm:$0xff]  ;;  %563 = vmatpush.bf16.msra.mxu0 %v1970_v50  ;;  %v479_v2 = vpack.c.bf16 %v476_v60, %v475_v59  ;;  %v582_v25 = vld [vmem:[#allocation2 + $0x37] sm:$0xff] }
  0xa4   :  { %v2224_v38 = vld [vmem:[#allocation2 + $0x2e] sm:$0xff]  ;;  %v135_v43 = vpack.c.bf16 %v2222_v37, %v132_v17  ;;  %615 = vmatpush.bf16.msra.mxu1 %v1972_v51  ;;  %v530_v24 = vld [vmem:[#allocation2 + $0x36] sm:$0xff]  ;;  %v584_v28 = vpack.c.bf16 %v582_v25, %v2222_v37 }
  0xa5   :  { %v2226_v40 = vld [vmem:[#allocation2 + $0x30] sm:$0xff]  ;;  %v125_v44 = vpack.c.bf16 %v2224_v38, %v122_v36  ;;  %667 = vmatpush.bf16.msra.mxu2 %v1974_v52  ;;  %v634_v26 = vld [vmem:[#allocation2 + $0x38] sm:$0xff]  ;;  %v532_v27 = vpack.c.bf16 %v530_v24, %v2224_v38 }
  0xa6   :  { %v269_v41 = vld [vmem:[#allocation2 + $0x29] sm:$0xff]  ;;  %v270_v42 = vld [vmem:[#allocation2 + $0x31] sm:$0xff]  ;;  %v220_v45 = vpack.c.bf16 %v2226_v40, %v217_v39  ;;  %v636_v4 = vpack.c.bf16 %v634_v26, %v2226_v40 }
  0xa7   :  { %v272_v46 = vpack.c.bf16 %v270_v42, %v269_v41  ;;  %v321_v3 = vld [vmem:[#allocation2 + $0x2a] sm:$0xff]  ;;  %v322_v6 = vld [vmem:[#allocation2 + $0x32] sm:$0xff] }
  0xa8   :  { %v373_v0 = vld [vmem:[#allocation2 + $0x2b] sm:$0xff]  ;;  %v374_v7 = vld [vmem:[#allocation2 + $0x33] sm:$0xff]  ;;  %v324_v11 = vpack.c.bf16 %v322_v6, %v321_v3 }
  0xa9   :  { %v425_v8 = vld [vmem:[#allocation2 + $0x2c] sm:$0xff]  ;;  %v426_v9 = vld [vmem:[#allocation2 + $0x34] sm:$0xff]  ;;  %v376_v12 = vpack.c.bf16 %v374_v7, %v373_v0 }
  0xaa   :  { %v477_v1 = vld [vmem:[#allocation2 + $0x2d] sm:$0xff]  ;;  %v478_v10 = vld [vmem:[#allocation2 + $0x35] sm:$0xff]  ;;  %v428_v13 = vpack.c.bf16 %v426_v9, %v425_v8 }
  0xab   :  { %v480_v14 = vpack.c.bf16 %v478_v10, %v477_v1 }
  0xae   :  { %1590 = vmatmul.msk.bf16.gmra.mxu0 %vm33_vm0, %v135_v43 }
  0xaf   :  { %1600 = vmatmul.msk.bf16.gmra.mxu1 %vm33_vm0, %v125_v44 }
  0xb0   :  { %1614 = vmatmul.msk.bf16.gmra.mxu2 %vm33_vm0, %v220_v45 }
  0xb1   :  { %1628 = vmatmul.msk.bf16.gmra.mxu3 %vm33_vm0, %v272_v46 }
  0xbe   :  { %1641 = vmatmul.msk.bf16.vlgmr.msrb.gmra.mxu0 %vm33_vm0, %v323_v61 }
  0xbf   :  { %1655 = vmatmul.msk.bf16.vlgmr.msrb.gmra.mxu1 %vm33_vm0, %v375_v62 }
  0xc0   :  { %1669 = vmatmul.msk.bf16.vlgmr.msrb.gmra.mxu2 %vm33_vm0, %v427_v63 }
  0xc1   :  { %1683 = vmatmul.msk.bf16.vlgmr.msrb.gmra.mxu3 %vm33_vm0, %v479_v2 }
  0xce   :  { %1642 = vmatmul.msk.bf16.gmra.mxu0 %vm33_vm0, %v324_v11 }
  0xcf   :  { %1656 = vmatmul.msk.bf16.gmra.mxu1 %vm33_vm0, %v376_v12 }
  0xd0   :  { %1670 = vmatmul.msk.bf16.gmra.mxu2 %vm33_vm0, %v428_v13 }
  0xd1   :  { %1684 = vmatmul.msk.bf16.gmra.mxu3 %vm33_vm0, %v480_v14 }
  0xde   :  { %1697 = vmatmul.msk.bf16.vlgmr.msra.gmra.mxu0 %vm33_vm0, %v531_v20 }
  0xdf   :  { %1711 = vmatmul.msk.bf16.vlgmr.msra.gmra.mxu1 %vm33_vm0, %v583_v21 }
  0xe0   :  { %1725 = vmatmul.msk.bf16.vlgmr.msra.gmra.mxu2 %vm33_vm0, %v635_v22 }
  0xee   :  { %1698 = vmatmul.msk.bf16.gmra.mxu0 %vm33_vm0, %v532_v27 }
  0xef   :  { %1712 = vmatmul.msk.bf16.gmra.mxu1 %vm33_vm0, %v584_v28 }
  0xf0   :  { %1726 = vmatmul.msk.bf16.gmra.mxu2 %vm33_vm0, %v636_v4  ;;  %v1978_v4 = vld [vmem:[%s2491_s4 + $0x10] sm:$0xff] }
  0xf1   :  { %876 = vmatpush.bf16.msrb.mxu0 %v1978_v4 }
 0x11b   :  { %v168_v29 = vpop.f32.mrf.mxu0 }
 0x11c   :  { %v205_v30 = vpop.f32.mrf.mxu1 }
 0x11d   :  { %v206_v47 = vadd.f32 %v205_v30, %v168_v29 }
 0x123   :  { %v253_v31 = vpop.f32.mrf.mxu2  ;;  %v170_v5 = vpop.f32.mrf.mxu0 }
 0x124   :  { %v207_v32 = vpop.f32.mrf.mxu1  ;;  %v305_v17 = vpop.f32.mrf.mxu3  ;;  %v263_v50 = vadd.f32 %v253_v31, %v206_v47 }
 0x125   :  { %v208_v54 = vadd.f32 %v207_v32, %v170_v5 }
 0x126   :  { %v315_v53 = vadd.f32 %v305_v17, %v263_v50 }
 0x12b   :  { %v255_v33 = vpop.f32.mrf.mxu2  ;;  %v173_v34 = vpop.f32.mrf.mxu0 }
 0x12c   :  { %v210_v35 = vpop.f32.mrf.mxu1  ;;  %v307_v39 = vpop.f32.mrf.mxu3  ;;  %v264_v57 = vadd.f32 %v255_v33, %v208_v54 }
 0x12d   :  { %v211_v2 = vadd.f32 %v210_v35, %v173_v34  ;;  %v1977_v34 = vld [vmem:[%s2491_s4 + $0x8] sm:$0xff] }
 0x12e   :  { %v316_v62 = vadd.f32 %v307_v39, %v264_v57  ;;  %877 = vmatpush.bf16.msrb.mxu0 %v1977_v34 }
 0x133   :  { %v258_v36 = vpop.f32.mrf.mxu2  ;;  %v175_v38 = vpop.f32.mrf.mxu0 }
 0x134   :  { %v212_v37 = vpop.f32.mrf.mxu1  ;;  %v310_v43 = vpop.f32.mrf.mxu3  ;;  %v265_v6 = vadd.f32 %v258_v36, %v211_v2 }
 0x135   :  { %v213_v13 = vadd.f32 %v212_v37, %v175_v38 }
 0x136   :  { %v317_v11 = vadd.f32 %v310_v43, %v265_v6  ;;  %v1984_v43 = vld [vmem:[%s2491_s4 + $0x40] sm:$0xff] }
 0x137   :  { %932 = vmatpush.bf16.msrb.mxu1 %v1984_v43  ;;  %v779_v43 = vld [vmem:[#allocation3] sm:$0xff] }
 0x13b   :  { %v260_v40 = vpop.f32.mrf.mxu2  ;;  %v357_v41 = vpop.f32.mrf.mxu0 }
 0x13c   :  { %v409_v42 = vpop.f32.mrf.mxu1  ;;  %v312_v48 = vpop.f32.mrf.mxu3  ;;  %v367_v55 = vadd.f32 %v357_v41, %v315_v53  ;;  %v266_v20 = vadd.f32 %v260_v40, %v213_v13  ;;  %v1981_v41 = vld [vmem:[%s2491_s4 + $0x28] sm:$0xff]  ;;  %v1986_v53 = vld [vmem:[%s2491_s4 + $0x50] sm:$0xff] }
 0x13d   :  { %833 = vmatpush.bf16.msra.mxu3 %v1981_v41  ;;  %v1999_v41 = vld [vmem:[%s2491_s4 + $0xb8] sm:$0xff] }
 0x13e   :  { %v419_v61 = vadd.f32 %v409_v42, %v367_v55  ;;  %v318_v29 = vadd.f32 %v312_v48, %v266_v20  ;;  %v1976_v42 = vld [vmem:[%s2491_s4] sm:$0xff] }
 0x13f   :  { %878 = vmatpush.bf16.msrb.mxu0 %v1976_v42 }
 0x143   :  { %v461_v44 = vpop.f32.mrf.mxu2  ;;  %v359_v45 = vpop.f32.mrf.mxu0 }
 0x144   :  { %v411_v46 = vpop.f32.mrf.mxu1  ;;  %v513_v60 = vpop.f32.mrf.mxu3  ;;  %v471_v63 = vadd.f32 %v461_v44, %v419_v61  ;;  %v368_v3 = vadd.f32 %v359_v45, %v316_v62  ;;  %v1987_v45 = vld [vmem:[%s2491_s4 + $0x58] sm:$0xff]  ;;  %v1982_v62 = vld [vmem:[%s2491_s4 + $0x30] sm:$0xff] }
 0x145   :  { %992 = vmatpush.bf16.msrb.mxu2 %v1987_v45  ;;  %v1979_v61 = vld [vmem:[%s2491_s4 + $0x18] sm:$0xff] }
 0x146   :  { %v523_v0 = vadd.f32 %v513_v60, %v471_v63  ;;  %v420_v9 = vadd.f32 %v411_v46, %v368_v3  ;;  %v1985_v63 = vld [vmem:[%s2491_s4 + $0x48] sm:$0xff] }
 0x149   :  { %993 = vmatpush.bf16.msrb.mxu2 %v1986_v53  ;;  %v1995_v53 = vld [vmem:[%s2491_s4 + $0x98] sm:$0xff] }
 0x14b   :  { %v463_v49 = vpop.f32.mrf.mxu2  ;;  %v362_v51 = vpop.f32.mrf.mxu0 }
 0x14c   :  { %v414_v52 = vpop.f32.mrf.mxu1  ;;  %v515_v10 = vpop.f32.mrf.mxu3  ;;  %v472_v12 = vadd.f32 %v463_v49, %v420_v9  ;;  %v369_v14 = vadd.f32 %v362_v51, %v317_v11  ;;  %v1980_v51 = vld [vmem:[%s2491_s4 + $0x20] sm:$0xff] }
 0x14d   :  { %834 = vmatpush.bf16.msra.mxu3 %v1980_v51  ;;  %994 = vmatpush.bf16.msrb.mxu2 %v1985_v63 }
 0x14e   :  { %v524_v21 = vadd.f32 %v515_v10, %v472_v12  ;;  %v421_v26 = vadd.f32 %v414_v52, %v369_v14  ;;  %v1983_v52 = vld [vmem:[%s2491_s4 + $0x38] sm:$0xff] }
 0x14f   :  { %933 = vmatpush.bf16.msrb.mxu1 %v1983_v52 }
 0x151   :  { %835 = vmatpush.bf16.msra.mxu3 %v1979_v61  ;;  %1232 = vmatpush.bf16.msra.mxu2 %v1999_v41  ;;  %v1988_v61 = vld [vmem:[%s2491_s4 + $0x60] sm:$0xff]  ;;  %v2007_v41 = vld [vmem:[%s2491_s4 + $0xf8] sm:$0xff] }
 0x153   :  { %v466_v56 = vpop.f32.mrf.mxu2  ;;  %v364_v58 = vpop.f32.mrf.mxu0  ;;  %934 = vmatpush.bf16.msrb.mxu1 %v1982_v62  ;;  %v1994_v62 = vld [vmem:[%s2491_s4 + $0x90] sm:$0xff] }
 0x154   :  { %v416_v59 = vpop.f32.mrf.mxu1  ;;  %v473_v30 = vadd.f32 %v466_v56, %v421_v26  ;;  %v518_v5 = vpop.f32.mrf.mxu3  ;;  %v370_v32 = vadd.f32 %v364_v58, %v318_v29 }
 0x156   :  { %v525_v17 = vadd.f32 %v518_v5, %v473_v30  ;;  %v422_v37 = vadd.f32 %v416_v59, %v370_v32 }
 0x15b   :  { %v468_v19 = vpop.f32.mrf.mxu2  ;;  %v565_v7 = vpop.f32.mrf.mxu0 }
 0x15c   :  { %v617_v8 = vpop.f32.mrf.mxu1  ;;  %v575_v1 = vadd.f32 %v565_v7, %v523_v0  ;;  %v474_v47 = vadd.f32 %v468_v19, %v422_v37  ;;  %v520_v54 = vpop.f32.mrf.mxu3 }
 0x15e   :  { %v627_v15 = vadd.f32 %v617_v8, %v575_v1  ;;  %v526_v56 = vadd.f32 %v520_v54, %v474_v47  ;;  %v1998_v54 = vld [vmem:[%s2491_s4 + $0xb0] sm:$0xff] }
 0x15f   :  { %1233 = vmatpush.bf16.msra.mxu2 %v1998_v54 }
 0x163   :  { %v669_v16 = vpop.f32.mrf.mxu2  ;;  %v567_v24 = vpop.f32.mrf.mxu0 }
 0x164   :  { %v679_v22 = vadd.f32 %v669_v16, %v627_v15  ;;  %v619_v25 = vpop.f32.mrf.mxu1  ;;  %v576_v28 = vadd.f32 %v567_v24, %v524_v21  ;;  %v1993_v21 = vld [vmem:[%s2491_s4 + $0x88] sm:$0xff] }
 0x165   :  { %1112 = vmatpush.bf16.msra.mxu0 %v1993_v21 }
 0x166   :  { %v2284_v27 = vadd.f32 %v2281_v18, %v679_v22  ;;  %v628_v33 = vadd.f32 %v619_v25, %v576_v28 }
 0x168   :  { %v1727_v31 = vmul.f32 -1.442695, %v2284_v27 }
 0x16a   :  { %2026 = vpow2.f32 %v1727_v31 }
 0x16b   :  { %v671_v35 = vpop.f32.mrf.mxu2  ;;  %v570_v38 = vpop.f32.mrf.mxu0 }
 0x16c   :  { %v680_v36 = vadd.f32 %v671_v35, %v628_v33  ;;  %v577_v40 = vadd.f32 %v570_v38, %v525_v17  ;;  %v622_v44 = vpop.f32.mrf.mxu1 }
 0x16e   :  { %v2294_v39 = vadd.f32 %v2281_v18, %v680_v36  ;;  %v629_v50 = vadd.f32 %v622_v44, %v577_v40  ;;  %v1992_v36 = vld [vmem:[%s2491_s4 + $0x80] sm:$0xff]  ;;  %v1991_v44 = vld [vmem:[%s2491_s4 + $0x78] sm:$0xff] }
 0x16f   :  { %v1996_v40 = vld [vmem:[%s2491_s4 + $0xa0] sm:$0xff]  ;;  %1113 = vmatpush.bf16.msra.mxu0 %v1992_v36 }
 0x170   :  { %v2027_v46 = vpop.eup %2026  ;;  %v1728_v48 = vmul.f32 -1.442695, %v2294_v39  ;;  %1172 = vmatpush.bf16.msra.mxu1 %v1996_v40  ;;  %v2001_v40 = vld [vmem:[%s2491_s4 + $0xc8] sm:$0xff] }
 0x171   :  { %v702_v49 = vadd.f32 1.0, %v2027_v46 }
 0x172   :  { %2028 = vpow2.f32 %v1728_v48 }
 0x173   :  { %2030 = vrcp.f32 %v702_v49  ;;  %v674_v55 = vpop.f32.mrf.mxu2  ;;  %v572_v58 = vpop.f32.mrf.mxu0  ;;  %v717_v11 = vand.u32 2147483648, %v702_v49  ;;  %v715_v13 = vand.u32 2147483647, %v702_v49  ;;  %vm711_vm1 = vweird.f32 %v702_v49  ;;  %1114 = vmatpush.bf16.msra.mxu0 %v1991_v44 }
 0x174   :  { %v681_v57 = vadd.f32 %v674_v55, %v629_v50  ;;  %v578_v60 = vadd.f32 %v572_v58, %v526_v56  ;;  %v624_v0 = vpop.f32.mrf.mxu1  ;;  %1173 = vmatpush.bf16.msra.mxu1 %v1995_v53 }
 0x175   :  { %v718_v24 = vor.u32 1.1754944e-38, %v717_v11  ;;  %vm716_vm3 = vcmp.eq.f32.partialorder %v715_v13, 8.507059e+37  ;;  %v1997_v13 = vld [vmem:[%s2491_s4 + $0xa8] sm:$0xff] }
 0x176   :  { %v2319_v59 = vadd.f32 %v2281_v18, %v681_v57  ;;  %v630_v8 = vadd.f32 %v624_v0, %v578_v60  ;;  %1234 = vmatpush.bf16.msra.mxu2 %v1997_v13 }
 0x178   :  { %v2029_v2 = vpop.eup %2028  ;;  %v1729_v3 = vmul.f32 -1.442695, %v2319_v59  ;;  %1174 = vmatpush.bf16.msra.mxu1 %v1994_v62 }
 0x179   :  { %v2031_v19 = vpop.eup %2030  ;;  %v703_v6 = vadd.f32 1.0, %v2029_v2 }
 0x17a   :  { %v707_v7 = vmul.f32 %v2031_v19, %v702_v49  ;;  %2032 = vpow2.f32 %v1729_v3  ;;  %vm712_vm15 = vweird.f32 %v2031_v19 }
 0x17b   :  { %2034 = vrcp.f32 %v703_v6  ;;  %v676_v9 = vpop.f32.mrf.mxu2  ;;  %vm713_vm2 = vmor %vm711_vm1, %vm712_vm15  ;;  %v732_v30 = vand.u32 2147483648, %v703_v6  ;;  %v730_v5 = vand.u32 2147483647, %v703_v6  ;;  %vm726_vm5 = vweird.f32 %v703_v6 }
 0x17c   :  { %v708_v1 = vsub.f32 1.0, %v707_v7  ;;  %v682_v10 = vadd.f32 %v676_v9, %v630_v8 }
 0x17d   :  { %v733_v35 = vor.u32 1.1754944e-38, %v732_v30  ;;  %vm731_vm7 = vcmp.eq.f32.partialorder %v730_v5, 8.507059e+37 }
 0x17e   :  { %v709_v12 = vmul.f32 %v2031_v19, %v708_v1  ;;  %v2332_v14 = vadd.f32 %v2281_v18, %v682_v10 }
 0x180   :  { %v2033_v15 = vpop.eup %2032  ;;  %v710_v16 = vadd.f32 %v2031_v19, %v709_v12  ;;  %v1730_v20 = vmul.f32 -1.442695, %v2332_v14 }
 0x181   :  { %v2035_v22 = vpop.eup %2034  ;;  %v704_v25 = vadd.f32 1.0, %v2033_v15 }
 0x182   :  { %v714_v26 = vsel %vm713_vm2, %v2031_v19, %v710_v16  ;;  %v722_v28 = vmul.f32 %v2035_v22, %v703_v6  ;;  %2036 = vpow2.f32 %v1730_v20  ;;  %vm727_vm4 = vweird.f32 %v2035_v22 }
 0x183   :  { %v719_v18 = vsel %vm716_vm3, %v718_v24, %v714_v26  ;;  %2038 = vrcp.f32 %v704_v25  ;;  %vm728_vm6 = vmor %vm726_vm5, %vm727_vm4  ;;  %v747_v47 = vand.u32 2147483648, %v704_v25  ;;  %v745_v50 = vand.u32 2147483647, %v704_v25 }
 0x184   :  { %v766_v4 = vmul.f32 %v719_v18, %v2284_v27  ;;  %v723_v29 = vsub.f32 1.0, %v722_v28  ;;  %v1990_v27 = vld [vmem:[%s2491_s4 + $0x70] sm:$0xff]  ;;  %vm741_vm9 = vweird.f32 %v704_v25  ;;  %v2005_v28 = vld [vmem:[%s2491_s4 + $0xe8] sm:$0xff] }
 0x185   :  { %1052 = vmatpush.bf16.msrb.mxu3 %v1990_v27  ;;  %v748_v56 = vor.u32 1.1754944e-38, %v747_v47  ;;  %vm746_vm11 = vcmp.eq.f32.partialorder %v745_v50, 8.507059e+37  ;;  %v2003_v27 = vld [vmem:[%s2491_s4 + $0xd8] sm:$0xff] }
 0x186   :  { %773 = vst.msk [vmem:[#allocation3 + $0x8] sm:$0xff] %vm770_vm14, %v766_v4  ;;  %v724_v31 = vmul.f32 %v2035_v22, %v723_v29 }
 0x188   :  { %v2037_v32 = vpop.eup %2036  ;;  %v725_v33 = vadd.f32 %v2035_v22, %v724_v31 }
 0x189   :  { %v2039_v34 = vpop.eup %2038  ;;  %v2340_v17 = vadd.f32 1.0, %v2037_v32 }
 0x18a   :  { %v729_v38 = vsel %vm728_vm6, %v2035_v22, %v725_v33  ;;  %v737_v37 = vmul.f32 %v2039_v34, %v704_v25  ;;  %vm742_vm8 = vweird.f32 %v2039_v34  ;;  %v781_v22 = vld [vmem:[#allocation3 + $0x20] sm:$0xff] }
 0x18b   :  { %v734_v42 = vsel %vm731_vm7, %v733_v35, %v729_v38  ;;  %2040 = vrcp.f32 %v2340_v17  ;;  %vm743_vm10 = vmor %vm741_vm9, %vm742_vm8  ;;  %v760_v0 = vand.u32 2147483647, %v2340_v17  ;;  %v762_v7 = vand.u32 2147483648, %v2340_v17  ;;  %v2002_v35 = vld [vmem:[%s2491_s4 + $0xd0] sm:$0xff] }
 0x18c   :  { %v767_v45 = vmul.f32 %v734_v42, %v2294_v39  ;;  %v738_v46 = vsub.f32 1.0, %v737_v37  ;;  %v1989_v39 = vld [vmem:[%s2491_s4 + $0x68] sm:$0xff]  ;;  %vm756_vm13 = vweird.f32 %v2340_v17  ;;  %v2000_v42 = vld [vmem:[%s2491_s4 + $0xc0] sm:$0xff]  ;;  %vm1513_vm9 = vcmask 130048  }
 0x18d   :  { %v2359_v48 = vld [vmem:[#allocation3 + $0x8] sm:$0xff]  ;;  %1053 = vmatpush.bf16.msrb.mxu3 %v1989_v39  ;;  %v763_v16 = vor.u32 1.1754944e-38, %v762_v7  ;;  %vm761_vm1 = vcmp.eq.f32.partialorder %v760_v0, 8.507059e+37 }
 0x18e   :  { %774 = vst.msk [vmem:[#allocation3 + $0x10] sm:$0xff] %vm770_vm14, %v767_v45  ;;  %v739_v49 = vmul.f32 %v2039_v34, %v738_v46  ;;  %v783_v51 = vpack.c.bf16 %v2359_v48, %v779_v43  ;;  %v791_v3 = vld [vmem:[#allocation3 + $0x1] sm:$0xff]  ;;  %v2006_v43 = vld [vmem:[%s2491_s4 + $0xf0] sm:$0xff] }
 0x18f   :  { %v890_v19 = vld [vmem:[#allocation3 + $0x2] sm:$0xff] }
 0x190   :  { %v740_v52 = vadd.f32 %v2039_v34, %v739_v49  ;;  %1763 = vmatmul.msk.bf16.vlgmr.msrb.gmra.mxu0 %vm770_vm14, %v783_v51  ;;  %v950_v6 = vld [vmem:[#allocation3 + $0x3] sm:$0xff] }
 0x191   :  { %v2041_v55 = vpop.eup %2040  ;;  %1054 = vmatpush.bf16.msrb.mxu3 %v1988_v61  ;;  %1352 = vmatpush.bf16.msrb.mxu0 %v2005_v28  ;;  %v1070_v38 = vld [vmem:[#allocation3 + $0x5] sm:$0xff] }
 0x192   :  { %v744_v57 = vsel %vm743_vm10, %v2039_v34, %v740_v52  ;;  %v752_v58 = vmul.f32 %v2041_v55, %v2340_v17  ;;  %vm757_vm12 = vweird.f32 %v2041_v55  ;;  %v2004_v34 = vld [vmem:[%s2491_s4 + $0xe0] sm:$0xff] }
 0x193   :  { %v749_v60 = vsel %vm746_vm11, %v748_v56, %v744_v57  ;;  %vm758_vm15 = vmor %vm756_vm13, %vm757_vm12  ;;  %v2008_v17 = vld [vmem:[%s2491_s4 + $0x100] sm:$0xff]  ;;  %vm1570_vm12 = vcmask 258048  }
 0x194   :  { %v768_v63 = vmul.f32 %v749_v60, %v2319_v59  ;;  %v753_v2 = vsub.f32 1.0, %v752_v58  ;;  %v1010_v47 = vld [vmem:[#allocation3 + $0x4] sm:$0xff] }
 0x195   :  { %v2383_v8 = vld [vmem:[#allocation3 + $0x9] sm:$0xff]  ;;  %1353 = vmatpush.bf16.msrb.mxu0 %v2004_v34  ;;  %v1371_v7 = vld [vmem:[#allocation3 + $0x12] sm:$0xff] }
 0x196   :  { %v2385_v9 = vld [vmem:[#allocation3 + $0xa] sm:$0xff]  ;;  %775 = vst.msk [vmem:[#allocation3 + $0x28] sm:$0xff] %vm770_vm14, %v768_v63  ;;  %v754_v10 = vmul.f32 %v2041_v55, %v753_v2  ;;  %v795_v11 = vpack.c.bf16 %v2383_v8, %v791_v3 }
 0x197   :  { %v951_v1 = vld [vmem:[#allocation3 + $0xb] sm:$0xff]  ;;  %v894_v59 = vpack.c.bf16 %v2385_v9, %v890_v19 }
 0x198   :  { %v954_v12 = vpack.c.bf16 %v951_v1, %v950_v6  ;;  %v755_v15 = vadd.f32 %v2041_v55, %v754_v10  ;;  %1749 = vmatmul.msk.bf16.vlgmr.msra.gmra.mxu3 %vm770_vm14, %v795_v11  ;;  %v1071_v36 = vld [vmem:[#allocation3 + $0xd] sm:$0xff]  ;;  %v1374_v10 = vpack.c.bf16 %v1371_v7, %v2385_v9 }
 0x199   :  { %1783 = vmatmul.msk.bf16.vlgmr.msrb.gmra.mxu1 %vm770_vm14, %v894_v59  ;;  %1292 = vmatpush.bf16.msra.mxu3 %v2002_v35  ;;  %v1074_v37 = vpack.c.bf16 %v1071_v36, %v1070_v38  ;;  %v1011_v44 = vld [vmem:[#allocation3 + $0xc] sm:$0xff] }
 0x19a   :  { %1803 = vmatmul.msk.bf16.vlgmr.msrb.gmra.mxu2 %vm770_vm14, %v954_v12  ;;  %v759_v20 = vsel %vm758_vm15, %v2041_v55, %v755_v15  ;;  %1412 = vmatpush.bf16.msrb.mxu1 %v2008_v17  ;;  %v1131_v45 = vld [vmem:[#allocation3 + $0xe] sm:$0xff]  ;;  %v1130_v49 = vld [vmem:[#allocation3 + $0x6] sm:$0xff]  ;;  %v1014_v50 = vpack.c.bf16 %v1011_v44, %v1010_v47 }
 0x19b   :  { %v764_v21 = vsel %vm761_vm1, %v763_v16, %v759_v20  ;;  %1354 = vmatpush.bf16.msrb.mxu0 %v2003_v27  ;;  %v1191_v46 = vld [vmem:[#allocation3 + $0xf] sm:$0xff]  ;;  %v1134_v51 = vpack.c.bf16 %v1131_v45, %v1130_v49  ;;  %v1190_v52 = vld [vmem:[#allocation3 + $0x7] sm:$0xff] }
 0x19c   :  { %v769_v24 = vmul.f32 %v764_v21, %v2332_v14  ;;  %v1194_v39 = vpack.c.bf16 %v1191_v46, %v1190_v52  ;;  %v1311_v19 = vld [vmem:[#allocation3 + $0x11] sm:$0xff] }
 0x19d   :  { %v2399_v25 = vld [vmem:[#allocation3 + $0x28] sm:$0xff]  ;;  %1293 = vmatpush.bf16.msra.mxu3 %v2001_v40  ;;  %v1314_v6 = vpack.c.bf16 %v1311_v19, %v2383_v8  ;;  %v1251_v0 = vld [vmem:[#allocation3 + $0x10] sm:$0xff] }
 0x19e   :  { %776 = vst.msk [vmem:[#allocation3 + $0x30] sm:$0xff] %vm770_vm14, %v769_v24  ;;  %v784_v26 = vpack.c.bf16 %v2399_v25, %v781_v22  ;;  %v793_v18 = vld [vmem:[#allocation3 + $0x21] sm:$0xff]  ;;  %1413 = vmatpush.bf16.msrb.mxu1 %v2007_v41  ;;  %v1254_v1 = vpack.c.bf16 %v1251_v0, %v2359_v48  ;;  %v2463_v48 = vld [vmem:[%s2489_s1] ss:$0 sm:$0xff] }
 0x19f   :  { %v892_v4 = vld [vmem:[#allocation3 + $0x22] sm:$0xff]  ;;  %1432 = vrot.lane.b32.xlu2 %v2463_v48, %s2058_s15 }
 0x1a0   :  { %1764 = vmatmul.msk.bf16.gmra.mxu0 %vm770_vm14, %v784_v26  ;;  %v952_v29 = vld [vmem:[#allocation3 + $0x23] sm:$0xff] }
 0x1a1   :  { %1294 = vmatpush.bf16.msra.mxu3 %v2000_v42  ;;  %v1072_v54 = vld [vmem:[#allocation3 + $0x25] sm:$0xff] }
 0x1a2   :  { %1414 = vmatpush.bf16.msrb.mxu1 %v2006_v43  ;;  %v1012_v60 = vld [vmem:[#allocation3 + $0x24] sm:$0xff] }
 0x1a3   :  { %v1132_v61 = vld [vmem:[#allocation3 + $0x26] sm:$0xff] }
 0x1a4   :  { %v1192_v2 = vld [vmem:[#allocation3 + $0x27] sm:$0xff] }
 0x1a5   :  { %v2407_v30 = vld [vmem:[#allocation3 + $0x29] sm:$0xff]  ;;  %v1313_v11 = vld [vmem:[#allocation3 + $0x31] sm:$0xff] }
 0x1a6   :  { %v2409_v31 = vld [vmem:[#allocation3 + $0x2a] sm:$0xff]  ;;  %v796_v5 = vpack.c.bf16 %v2407_v30, %v793_v18  ;;  %v1315_v59 = vpack.c.bf16 %v1313_v11, %v2407_v30  ;;  %v1373_v13 = vld [vmem:[#allocation3 + $0x32] sm:$0xff] }
 0x1a7   :  { %v953_v14 = vld [vmem:[#allocation3 + $0x2b] sm:$0xff]  ;;  %v895_v32 = vpack.c.bf16 %v2409_v31, %v892_v4  ;;  %v1375_v15 = vpack.c.bf16 %v1373_v13, %v2409_v31 }
 0x1a8   :  { %v955_v33 = vpack.c.bf16 %v953_v14, %v952_v29  ;;  %1750 = vmatmul.msk.bf16.gmra.mxu3 %vm770_vm14, %v796_v5  ;;  %v1073_v53 = vld [vmem:[#allocation3 + $0x2d] sm:$0xff] }
 0x1a9   :  { %1784 = vmatmul.msk.bf16.gmra.mxu1 %vm770_vm14, %v895_v32  ;;  %v1075_v55 = vpack.c.bf16 %v1073_v53, %v1072_v54  ;;  %v1013_v56 = vld [vmem:[#allocation3 + $0x2c] sm:$0xff] }
 0x1aa   :  { %1804 = vmatmul.msk.bf16.gmra.mxu2 %vm770_vm14, %v955_v33  ;;  %v1133_v57 = vld [vmem:[#allocation3 + $0x2e] sm:$0xff]  ;;  %v1015_v62 = vpack.c.bf16 %v1013_v56, %v1012_v60 }
 0x1ab   :  { %v1193_v58 = vld [vmem:[#allocation3 + $0x2f] sm:$0xff]  ;;  %v1135_v63 = vpack.c.bf16 %v1133_v57, %v1132_v61 }
 0x1ac   :  { %v1195_v3 = vpack.c.bf16 %v1193_v58, %v1192_v2  ;;  %v1253_v12 = vld [vmem:[#allocation3 + $0x30] sm:$0xff] }
 0x1ad   :  { %v1255_v8 = vpack.c.bf16 %v1253_v12, %v2399_v25 }
 0x1b0   :  { %1843 = vmatmul.msk.bf16.vlgmr.msra.gmra.mxu0 %vm770_vm14, %v1074_v37 }
 0x1b8   :  { %1823 = vmatmul.msk.bf16.vlgmr.msrb.gmra.mxu3 %vm770_vm14, %v1014_v50 }
 0x1b9   :  { %1863 = vmatmul.msk.bf16.vlgmr.msra.gmra.mxu1 %vm770_vm14, %v1134_v51 }
 0x1ba   :  { %1883 = vmatmul.msk.bf16.vlgmr.msra.gmra.mxu2 %vm770_vm14, %v1194_v39 }
 0x1c0   :  { %1844 = vmatmul.msk.bf16.gmra.mxu0 %vm770_vm14, %v1075_v55 }
 0x1c8   :  { %1824 = vmatmul.msk.bf16.gmra.mxu3 %vm770_vm14, %v1015_v62 }
 0x1c9   :  { %1864 = vmatmul.msk.bf16.gmra.mxu1 %vm770_vm14, %v1135_v63 }
 0x1ca   :  { %1884 = vmatmul.msk.bf16.gmra.mxu2 %vm770_vm14, %v1195_v3 }
 0x1d0   :  { %1923 = vmatmul.msk.bf16.vlgmr.msrb.gmra.mxu0 %vm770_vm14, %v1314_v6 }
 0x1d8   :  { %1903 = vmatmul.msk.bf16.vlgmr.msra.gmra.mxu3 %vm770_vm14, %v1254_v1 }
 0x1d9   :  { %1943 = vmatmul.msk.bf16.vlgmr.msrb.gmra.mxu1 %vm770_vm14, %v1374_v10 }
 0x1e0   :  { %1924 = vmatmul.msk.bf16.gmra.mxu0 %vm770_vm14, %v1315_v59 }
 0x1e8   :  { %1904 = vmatmul.msk.bf16.gmra.mxu3 %vm770_vm14, %v1255_v8 }
 0x1e9   :  { %1944 = vmatmul.msk.bf16.gmra.mxu1 %vm770_vm14, %v1375_v15 }
 0x20d   :  { %v880_v9 = vpop.f32.mrf.mxu0 }
 0x215   :  { %v882_v16 = vpop.f32.mrf.mxu0 }
 0x216   :  { %v936_v20 = vpop.f32.mrf.mxu1 }
 0x21b   :  { %v837_v21 = vpop.f32.mrf.mxu3 }
 0x21c   :  { %v881_v22 = vadd.f32 %v880_v9, %v837_v21 }
 0x21d   :  { %v885_v24 = vpop.f32.mrf.mxu0  ;;  %v996_v31 = vpop.f32.mrf.mxu2 }
 0x21e   :  { %v938_v25 = vpop.f32.mrf.mxu1  ;;  %v946_v26 = vadd.f32 %v936_v20, %v881_v22 }
 0x220   :  { %v1006_v2 = vadd.f32 %v996_v31, %v946_v26 }
 0x223   :  { %v839_v28 = vpop.f32.mrf.mxu3 }
 0x224   :  { %v883_v18 = vadd.f32 %v882_v16, %v839_v28 }
 0x225   :  { %v887_v4 = vpop.f32.mrf.mxu0  ;;  %v998_v34 = vpop.f32.mrf.mxu2 }
 0x226   :  { %v941_v29 = vpop.f32.mrf.mxu1  ;;  %v947_v30 = vadd.f32 %v938_v25, %v883_v18 }
 0x228   :  { %v1007_v61 = vadd.f32 %v998_v34, %v947_v30 }
 0x22b   :  { %v842_v14 = vpop.f32.mrf.mxu3 }
 0x22c   :  { %v886_v51 = vadd.f32 %v885_v24, %v842_v14 }
 0x22d   :  { %v1116_v32 = vpop.f32.mrf.mxu0  ;;  %v1001_v38 = vpop.f32.mrf.mxu2 }
 0x22e   :  { %v943_v5 = vpop.f32.mrf.mxu1  ;;  %v948_v54 = vadd.f32 %v941_v29, %v886_v51 }
 0x230   :  { %v1008_v57 = vadd.f32 %v1001_v38, %v948_v54  ;;  %v1431_v38 = vld [vmem:[%s2492_s2 + $0x8] sm:$0xff] }
 0x233   :  { %v844_v33 = vpop.f32.mrf.mxu3 }
 0x234   :  { %v888_v39 = vadd.f32 %v887_v4, %v844_v33 }
 0x235   :  { %v1118_v17 = vpop.f32.mrf.mxu0  ;;  %v1003_v42 = vpop.f32.mrf.mxu2 }
 0x236   :  { %v1176_v35 = vpop.f32.mrf.mxu1  ;;  %v949_v55 = vadd.f32 %v943_v5, %v888_v39 }
 0x238   :  { %v1009_v62 = vadd.f32 %v1003_v42, %v949_v55 }
 0x23b   :  { %v1056_v36 = vpop.f32.mrf.mxu3 }
 0x23c   :  { %v1066_v0 = vadd.f32 %v1056_v36, %v1006_v2 }
 0x23d   :  { %v1121_v37 = vpop.f32.mrf.mxu0  ;;  %v1236_v46 = vpop.f32.mrf.mxu2 }
 0x23e   :  { %v1178_v27 = vpop.f32.mrf.mxu1  ;;  %v1126_v12 = vadd.f32 %v1116_v32, %v1066_v0 }
 0x240   :  { %v1186_v16 = vadd.f32 %v1176_v35, %v1126_v12 }
 0x242   :  { %v1246_v28 = vadd.f32 %v1236_v46, %v1186_v16 }
 0x243   :  { %v1058_v40 = vpop.f32.mrf.mxu3 }
 0x244   :  { %v1067_v3 = vadd.f32 %v1058_v40, %v1007_v61 }
 0x245   :  { %v1123_v44 = vpop.f32.mrf.mxu0  ;;  %v1238_v53 = vpop.f32.mrf.mxu2 }
 0x246   :  { %v1181_v41 = vpop.f32.mrf.mxu1  ;;  %v1127_v1 = vadd.f32 %v1118_v17, %v1067_v3 }
 0x248   :  { %v1187_v15 = vadd.f32 %v1178_v27, %v1127_v1  ;;  %v1430_v27 = vld [vmem:[%s2492_s2] sm:$0xff]  ;;  %s2059_s2 = smov 32  }
 0x249   :  { %1565 = vrot.lane.b32.xlu2 %v2463_v48, %s2059_s2 }
 0x24a   :  { %v1247_v22 = vadd.f32 %v1238_v53, %v1187_v15 }
 0x24b   :  { %v1061_v43 = vpop.f32.mrf.mxu3 }
 0x24c   :  { %v1068_v63 = vadd.f32 %v1061_v43, %v1008_v57 }
 0x24d   :  { %v1356_v49 = vpop.f32.mrf.mxu0  ;;  %v1241_v6 = vpop.f32.mrf.mxu2 }
 0x24e   :  { %v1183_v45 = vpop.f32.mrf.mxu1  ;;  %v1128_v7 = vadd.f32 %v1121_v37, %v1068_v63  ;;  %v1433_v37 = vpop.permute.xlu2 %1432 }
 0x250   :  { %v1188_v13 = vadd.f32 %v1181_v41, %v1128_v7 }
 0x252   :  { %v1248_v20 = vadd.f32 %v1241_v6, %v1188_v13 }
 0x253   :  { %v1063_v47 = vpop.f32.mrf.mxu3 }
 0x254   :  { %v1069_v19 = vadd.f32 %v1063_v47, %v1009_v62 }
 0x255   :  { %v1358_v56 = vpop.f32.mrf.mxu0  ;;  %v1243_v21 = vpop.f32.mrf.mxu2 }
 0x256   :  { %v1416_v50 = vpop.f32.mrf.mxu1  ;;  %v1129_v10 = vadd.f32 %v1123_v44, %v1069_v19 }
 0x258   :  { %v1189_v9 = vadd.f32 %v1183_v45, %v1129_v10  ;;  %v2009_v45 = vld [vmem:[%s2493_s5] sm:$0xff] }
 0x259   :  { %1524 = vmatpush.bf16.msrb.mxu3 %v2009_v45 }
 0x25a   :  { %v1249_v24 = vadd.f32 %v1243_v21, %v1189_v9 }
 0x25b   :  { %v1296_v52 = vpop.f32.mrf.mxu3 }
 0x25c   :  { %v1306_v30 = vadd.f32 %v1296_v52, %v1246_v28 }
 0x25d   :  { %v1361_v11 = vpop.f32.mrf.mxu0 }
 0x25e   :  { %v1418_v58 = vpop.f32.mrf.mxu1  ;;  %v1366_v34 = vadd.f32 %v1356_v49, %v1306_v30 }
 0x260   :  { %v1426_v36 = vadd.f32 %v1416_v50, %v1366_v34 }
 0x263   :  { %v1298_v60 = vpop.f32.mrf.mxu3 }
 0x264   :  { %v1307_v18 = vadd.f32 %v1298_v60, %v1247_v22 }
 0x265   :  { %v1363_v29 = vpop.f32.mrf.mxu0 }
 0x266   :  { %v1421_v8 = vpop.f32.mrf.mxu1  ;;  %v1367_v32 = vadd.f32 %v1358_v56, %v1307_v18 }
 0x268   :  { %v1427_v35 = vadd.f32 %v1418_v58, %v1367_v32 }
 0x26b   :  { %v1301_v59 = vpop.f32.mrf.mxu3 }
 0x26c   :  { %v1308_v25 = vadd.f32 %v1301_v59, %v1248_v20 }
 0x26e   :  { %v1368_v31 = vadd.f32 %v1361_v11, %v1308_v25  ;;  %v1423_v5 = vpop.f32.mrf.mxu1 }
 0x270   :  { %v1428_v17 = vadd.f32 %v1421_v8, %v1368_v31 }
 0x273   :  { %v1303_v26 = vpop.f32.mrf.mxu3 }
 0x274   :  { %v1309_v4 = vadd.f32 %v1303_v26, %v1249_v24 }
 0x276   :  { %v1369_v14 = vadd.f32 %v1363_v29, %v1309_v4 }
 0x278   :  { %v1429_v33 = vadd.f32 %v1423_v5, %v1369_v14 }
 0x27a   :  { %1453 = vmatpush.msrb.mxu2 %v1429_v33 }
 0x27c   :  { %1454 = vmatpush.msrb.mxu2 %v1428_v17 }
 0x27e   :  { %1455 = vmatpush.msrb.mxu2 %v1427_v35 }
 0x280   :  { %1456 = vmatpush.msrb.mxu2 %v1426_v36 }
 0x281   :  { %1945 = vmatmul.msk.f32.vlgmr.msrb.gmra.mxu2 %vm33_vm0, %v1430_v27 }
 0x289   :  { %1946 = vmatmul.msk.f32.gmra.mxu2 %vm33_vm0, %v1431_v38 }
 0x2a3   :  { %v1566_v33 = vpop.permute.xlu2 %1565 }
 0x304   :  { %v1458_v40 = vpop.f32.mrf.mxu2 }
 0x305   :  { %v1459_v41 = vadd.f32 %v1458_v40, %v1433_v37 }
 0x307   :  { %v1947_v42 = vmul.f32 -1.442695, %v1459_v41 }
 0x309   :  { %2042 = vpow2.f32 %v1947_v42 }
 0x30c   :  { %v1461_v43 = vpop.f32.mrf.mxu2 }
 0x30d   :  { %v1462_v44 = vadd.f32 %v1461_v43, %v1433_v37 }
 0x30f   :  { %v2043_v46 = vpop.eup %2042  ;;  %v1948_v47 = vmul.f32 -1.442695, %v1462_v44 }
 0x310   :  { %v1470_v49 = vadd.f32 1.0, %v2043_v46 }
 0x311   :  { %2044 = vpow2.f32 %v1948_v47 }
 0x312   :  { %2046 = vrcp.f32 %v1470_v49  ;;  %v1483_v58 = vand.u32 2147483648, %v1470_v49  ;;  %vm1477_vm2 = vweird.f32 %v1470_v49  ;;  %v1481_v60 = vand.u32 2147483647, %v1470_v49 }
 0x314   :  { %v1484_v19 = vor.u32 1.1754944e-38, %v1483_v58  ;;  %vm1482_vm5 = vcmp.eq.f32.partialorder %v1481_v60, 8.507059e+37 }
 0x317   :  { %v2045_v50 = vpop.eup %2044 }
 0x318   :  { %v2047_v51 = vpop.eup %2046  ;;  %v1471_v52 = vadd.f32 1.0, %v2045_v50 }
 0x319   :  { %v1473_v39 = vmul.f32 %v2047_v51, %v1470_v49  ;;  %vm1478_vm14 = vweird.f32 %v2047_v51 }
 0x31a   :  { %2048 = vrcp.f32 %v1471_v52  ;;  %vm1479_vm3 = vmor %vm1477_vm2, %vm1478_vm14  ;;  %v1498_v62 = vand.u32 2147483648, %v1471_v52  ;;  %v1496_v3 = vand.u32 2147483647, %v1471_v52  ;;  %vm1492_vm6 = vweird.f32 %v1471_v52 }
 0x31b   :  { %v1474_v53 = vsub.f32 1.0, %v1473_v39 }
 0x31c   :  { %v1499_v7 = vor.u32 1.1754944e-38, %v1498_v62  ;;  %vm1497_vm8 = vcmp.eq.f32.partialorder %v1496_v3, 8.507059e+37 }
 0x31d   :  { %v1475_v54 = vmul.f32 %v2047_v51, %v1474_v53 }
 0x31f   :  { %v1476_v56 = vadd.f32 %v2047_v51, %v1475_v54 }
 0x320   :  { %v2049_v55 = vpop.eup %2048 }
 0x321   :  { %v1488_v57 = vmul.f32 %v2049_v55, %v1471_v52  ;;  %v1480_v63 = vsel %vm1479_vm3, %v2047_v51, %v1476_v56  ;;  %vm1493_vm4 = vweird.f32 %v2049_v55 }
 0x322   :  { %v1485_v0 = vsel %vm1482_vm5, %v1484_v19, %v1480_v63  ;;  %vm1494_vm7 = vmor %vm1492_vm6, %vm1493_vm4 }
 0x323   :  { %v1489_v61 = vsub.f32 1.0, %v1488_v57  ;;  %v1502_v11 = vmul.f32 %v1485_v0, %v1459_v41 }
 0x325   :  { %v1490_v2 = vmul.f32 %v2049_v55, %v1489_v61 }
 0x327   :  { %v1491_v6 = vadd.f32 %v2049_v55, %v1490_v2 }
 0x329   :  { %v1495_v1 = vsel %vm1494_vm7, %v2049_v55, %v1491_v6 }
 0x32a   :  { %v1500_v10 = vsel %vm1497_vm8, %v1499_v7, %v1495_v1 }
 0x32b   :  { %v1503_v59 = vmul.f32 %v1500_v10, %v1462_v44 }
 0x32d   :  { %v1504_v12 = vpack.c.bf16 %v1503_v59, %v1502_v11 }
 0x32f   :  { %1953 = vmatmul.msk.bf16.vlgmr.msrb.gmra.mxu3 %vm1513_vm9, %v1504_v12 }
 0x3b2   :  { %v1526_v13 = vpop.f32.mrf.mxu3 }
 0x3b3   :  { %v1531_v8 = vmul.f32 %v1526_v13, %v1526_v13 }
 0x3b5   :  { %v1533_v15 = vsel %vm33_vm0, %v1531_v8, 0.0 }
 0x3b6   :  { %1534 = vadd.xlane.f32.xlu0 %v1533_v15 }
 0x3ba   :  { %v1528_v9 = vpop.f32.mrf.mxu3 }
 0x3bb   :  { %v1532_v16 = vmul.f32 %v1528_v9, %v1528_v9 }
 0x3bd   :  { %v1536_v20 = vsel %vm33_vm0, %v1532_v16, 0.0 }
 0x3be   :  { %1537 = vadd.xlane.f32.xlu1 %v1536_v20 }
 0x429   :  { %v1535_v21 = vpop.xlane.xlu0 %1534 }
 0x42a   :  { %v1539_v22 = vmul.f32 %v1535_v21, %v2146_v23 }
 0x42c   :  { %v1541_v24 = vadd.f32 1e-06, %v1539_v22 }
 0x42e   :  { %2050 = vrsqrt.f32 %v1541_v24  ;;  %vm1549_vm11 = vweird.f32 %v1541_v24 }
 0x431   :  { %v1538_v25 = vpop.xlane.xlu1 %1537 }
 0x432   :  { %v1540_v26 = vmul.f32 %v1538_v25, %v2146_v23 }
 0x434   :  { %v2051_v28 = vpop.eup %2050  ;;  %v1542_v48 = vadd.f32 1e-06, %v1540_v26 }
 0x435   :  { %v1544_v18 = vmul.f32 %v2051_v28, %v1541_v24  ;;  %vm1550_vm10 = vweird.f32 %v2051_v28 }
 0x436   :  { %2052 = vrsqrt.f32 %v1542_v48  ;;  %vm1551_vm0 = vmor %vm1549_vm11, %vm1550_vm10  ;;  %vm1559_vm15 = vweird.f32 %v1542_v48 }
 0x437   :  { %v1545_v4 = vmul.f32 %v2051_v28, %v1544_v18 }
 0x439   :  { %v1546_v29 = vmul.f32 0.5, %v1545_v4 }
 0x43b   :  { %v1547_v30 = vsub.f32 1.5, %v1546_v29 }
 0x43c   :  { %v2053_v31 = vpop.eup %2052 }
 0x43d   :  { %v1554_v14 = vmul.f32 %v2053_v31, %v1542_v48  ;;  %v1548_v5 = vmul.f32 %v2051_v28, %v1547_v30  ;;  %vm1560_vm13 = vweird.f32 %v2053_v31 }
 0x43e   :  { %vm1561_vm1 = vmor %vm1559_vm15, %vm1560_vm13 }
 0x43f   :  { %v1555_v32 = vmul.f32 %v2053_v31, %v1554_v14  ;;  %v1552_v34 = vsel %vm1551_vm0, %v2051_v28, %v1548_v5 }
 0x440   :  { %v1563_v17 = vmul.f32 %v1552_v34, %v1526_v13 }
 0x441   :  { %v1556_v35 = vmul.f32 0.5, %v1555_v32 }
 0x442   :  { %v1568_v23 = vmul.f32 %v1566_v33, %v1563_v17 }
 0x443   :  { %v1557_v36 = vsub.f32 1.5, %v1556_v35 }
 0x444   :  { %1571 = vst.msk [vmem:[%s2494_s6] sm:$0x1f] %vm1570_vm12, %v1568_v23 }
 0x445   :  { %v1558_v27 = vmul.f32 %v2053_v31, %v1557_v36 }
 0x447   :  { %v1562_v38 = vsel %vm1561_vm1, %v2053_v31, %v1558_v27 }
 0x448   :  { %v1564_v37 = vmul.f32 %v1562_v38, %v1528_v9 }
 0x44a   :  { %v1569_v40 = vmul.f32 %v1566_v33, %v1564_v37 }
 0x44c   :  { %1572 = vst.msk [vmem:[%s2494_s6 + $0x8] sm:$0x1f] %vm1570_vm12, %v1569_v40 }

</bundles_post_ra>
